<compile_context>
chip_gen: v5e
topology: v5e:2x2
jax: 0.10.0
libtpu: 0.0.40
codegen_flags: <defaults>
</compile_context>

<pallas_src>
import functools

import jax
import jax.numpy as jnp
import numpy as np
from jax import lax
from jax.experimental import pallas as pl
from jax.experimental.pallas import tpu as pltpu

_VMEM_LIMIT = 32 * 1024 * 1024   # explicit scoped-VMEM budget (safe on v5e..v7x)


# ----------------------------------------------------------------------------
# Tiling: pick a large lane-dense tile and a padded M that it divides.
# ----------------------------------------------------------------------------
def _round_up(x, mult):
    return ((x + mult - 1) // mult) * mult


def _choose_tiling(m, kk):
    """Return (tile_m, padded_m).

    Large tiles amortize the ~0.35us per-grid-step overhead; the cap keeps the
    double-buffered (kk, tm) bf16 patch tile at a few MiB of VMEM.
    """
    cap = 4096 if kk <= 160 else 2048
    m128 = _round_up(m, 128)
    if m128 <= cap:
        return m128, m128                       # single tile
    for t in (cap, cap // 2, cap // 4, 512, 256):
        if m128 % t == 0:
            return t, m128
    return 512, _round_up(m128, 512)            # bounded padding fallback


# ----------------------------------------------------------------------------
# Channel-major im2col producing patches^T of shape (Cin*K*K, N*OH*OW) in bf16.
# Row order is (ci, kh, kw) so it contracts directly against
# w_oihw.reshape(Cout, Cin*K*K) with no weight transpose.
# ----------------------------------------------------------------------------
def _im2col_T(x_cnhw, k, stride, pad):
    c, n, h, w = x_cnhw.shape
    xp = jnp.pad(x_cnhw, ((0, 0), (0, 0), (pad, pad), (pad, pad)))
    oh = (h + 2 * pad - k) // stride + 1
    ow = (w + 2 * pad - k) // stride + 1
    cols = []
    for kh in range(k):
        for kw in range(k):
            cols.append(xp[:, :, kh:kh + stride * oh:stride,
                              kw:kw + stride * ow:stride])
    pat = jnp.stack(cols, axis=1).reshape(c * k * k, n * oh * ow)
    return pat, (n, oh, ow)


# ----------------------------------------------------------------------------
# Kernel 1: fused  W @ patches^T  + bias + LeakyReLU   (layer 1, no BN)
# ----------------------------------------------------------------------------
def _gemm_bias_lrelu_kernel(w_ref, p_ref, b_ref, o_ref, *, alpha):
    y = jnp.dot(w_ref[...], p_ref[...], preferred_element_type=jnp.float32)
    y = y + b_ref[...]                                   # (Cout, 1) broadcast
    o_ref[...] = jnp.where(y > 0, y, alpha * y).astype(o_ref.dtype)


def _conv_bias_act(x_cnhw, w_oihw, bias, *, stride, pad, alpha=0.2):
    cout, cin, k, _ = w_oihw.shape
    pat, (n, oh, ow) = _im2col_T(x_cnhw, k, stride, pad)
    kk, m = pat.shape
    tm, m_pad = _choose_tiling(m, kk)
    if m_pad > m:
        pat = jnp.pad(pat, ((0, 0), (0, m_pad - m)))
    w2d = w_oihw.reshape(cout, kk).astype(jnp.bfloat16)

    out = pl.pallas_call(
        functools.partial(_gemm_bias_lrelu_kernel, alpha=alpha),
        out_shape=jax.ShapeDtypeStruct((cout, m_pad), jnp.bfloat16),
        grid=(m_pad // tm,),
        in_specs=[
            pl.BlockSpec((cout, kk), lambda i: (0, 0)),   # weight: resident
            pl.BlockSpec((kk, tm), lambda i: (0, i)),     # patch tile
            pl.BlockSpec((cout, 1), lambda i: (0, 0)),    # bias: resident
        ],
        out_specs=pl.BlockSpec((cout, tm), lambda i: (0, i)),
        compiler_params=pltpu.CompilerParams(
            dimension_semantics=("parallel",),
            vmem_limit_bytes=_VMEM_LIMIT),
    )(w2d, pat, bias.reshape(cout, 1).astype(jnp.float32))
    return out[:, :m].reshape(cout, n, oh, ow)


# ----------------------------------------------------------------------------
# Kernel 2a: GEMM per M tile + per-tile partial BN statistics (f32).
# Stats are written broadcast over 128 lanes so every block stays (8,128)
# aligned; the JAX side reads one lane per tile.
# ----------------------------------------------------------------------------
def _gemm_stats_kernel(w_ref, p_ref, y_ref, s_ref, q_ref):
    y = jnp.dot(w_ref[...], p_ref[...], preferred_element_type=jnp.float32)
    y_ref[...] = y.astype(y_ref.dtype)
    s = jnp.sum(y, axis=1, keepdims=True)
    q = jnp.sum(y * y, axis=1, keepdims=True)
    s_ref[...] = jnp.broadcast_to(s, s_ref.shape)
    q_ref[...] = jnp.broadcast_to(q, q_ref.shape)


# ----------------------------------------------------------------------------
# Kernel 2b: normalize + affine + LeakyReLU (embarrassingly parallel over M).
# ----------------------------------------------------------------------------
def _bn_apply_kernel(y_ref, sc_ref, sh_ref, o_ref, *, alpha):
    y = y_ref[...].astype(jnp.float32) * sc_ref[...] + sh_ref[...]
    o_ref[...] = jnp.where(y > 0, y, alpha * y).astype(o_ref.dtype)


def _conv_bn_act(x_cnhw, w_oihw, gamma, beta, *, stride, pad,
                 eps=1e-5, alpha=0.2):
    cout, cin, k, _ = w_oihw.shape
    pat, (n, oh, ow) = _im2col_T(x_cnhw, k, stride, pad)
    kk, m = pat.shape
    tm, m_pad = _choose_tiling(m, kk)
    if m_pad > m:
        pat = jnp.pad(pat, ((0, 0), (0, m_pad - m)))
    n_tiles = m_pad // tm
    w2d = w_oihw.reshape(cout, kk).astype(jnp.bfloat16)

    # Pass 1: GEMM + per-tile partial sums ("parallel" -> both TCs on v7x).
    y_pre, psum, psq = pl.pallas_call(
        _gemm_stats_kernel,
        out_shape=(jax.ShapeDtypeStruct((cout, m_pad), jnp.bfloat16),
                   jax.ShapeDtypeStruct((cout, n_tiles * 128), jnp.float32),
                   jax.ShapeDtypeStruct((cout, n_tiles * 128), jnp.float32)),
        grid=(n_tiles,),
        in_specs=[
            pl.BlockSpec((cout, kk), lambda i: (0, 0)),
            pl.BlockSpec((kk, tm), lambda i: (0, i)),
        ],
        out_specs=(pl.BlockSpec((cout, tm), lambda i: (0, i)),
                   pl.BlockSpec((cout, 128), lambda i: (0, i)),
                   pl.BlockSpec((cout, 128), lambda i: (0, i))),
        compiler_params=pltpu.CompilerParams(
            dimension_semantics=("parallel",),
            vmem_limit_bytes=_VMEM_LIMIT),
    )(w2d, pat)

    # Exact training-mode BN statistics in f32.  Padded patch columns are all
    # zero and the conv has no bias, so they contribute exactly 0 to both sums;
    # dividing by the true M keeps the stats exact under padding.
    total = jnp.sum(psum[:, ::128], axis=1, keepdims=True)
    total_sq = jnp.sum(psq[:, ::128], axis=1, keepdims=True)
    mu = total / m
    # Biased variance (PyTorch BN normalization).  Clamped >= 0 to guard the
    # E[x^2] - mu^2 cancellation noted in review (f32 accumulation throughout).
    var = jnp.maximum(total_sq / m - mu * mu, 0.0)
    scale = gamma.reshape(cout, 1).astype(jnp.float32) * lax.rsqrt(var + eps)
    shift = beta.reshape(cout, 1).astype(jnp.float32) - mu * scale

    # Pass 2: normalize + affine + LeakyReLU; lane-dense bf16 output tiles.
    out = pl.pallas_call(
        functools.partial(_bn_apply_kernel, alpha=alpha),
        out_shape=jax.ShapeDtypeStruct((cout, m_pad), jnp.bfloat16),
        grid=(n_tiles,),
        in_specs=[
            pl.BlockSpec((cout, tm), lambda i: (0, i)),
            pl.BlockSpec((cout, 1), lambda i: (0, 0)),
            pl.BlockSpec((cout, 1), lambda i: (0, 0)),
        ],
        out_specs=pl.BlockSpec((cout, tm), lambda i: (0, i)),
        compiler_params=pltpu.CompilerParams(
            dimension_semantics=("parallel",),
            vmem_limit_bytes=_VMEM_LIMIT),
    )(y_pre, scale, shift)
    return out[:, :m].reshape(cout, n, oh, ow)


# ----------------------------------------------------------------------------
# Discriminator forward (mirrors the PyTorch nn.Sequential)
# ----------------------------------------------------------------------------
def discriminator_forward(x_nchw, p):
    # NCHW -> channel-major CNHW; bf16 activations end-to-end between layers so
    # the (Cout, N*OH*OW) kernel output feeds the next layer transpose-free.
    x = jnp.transpose(x_nchw, (1, 0, 2, 3)).astype(jnp.bfloat16)
    x = _conv_bias_act(x, p["w1"], p["b1"], stride=2, pad=1)
    x = _conv_bn_act(x, p["w2"], p["g2"], p["be2"], stride=2, pad=1)
    x = _conv_bn_act(x, p["w3"], p["g3"], p["be3"], stride=2, pad=1)
    x = _conv_bn_act(x, p["w4"], p["g4"], p["be4"], stride=2, pad=1)
    # Final conv (Cout=1, one output per image) + exact sigmoid: left to XLA —
    # a Pallas kernel here is pure launch overhead + masked lane stores.
    x5 = jnp.transpose(x, (1, 0, 2, 3)).astype(jnp.float32)
    y5 = lax.conv_general_dilated(
        x5, p["w5"], (2, 2), [(0, 0), (0, 0)],
        dimension_numbers=("NCHW", "OIHW", "NCHW"))
    y5 = y5 + p["b5"][None, :, None, None]
    return jax.nn.sigmoid(y5)


# ----------------------------------------------------------------------------
# Pure-JAX f32 reference (numerical sanity check)
# ----------------------------------------------------------------------------
def _ref_conv(x, w, stride, pad):
    return lax.conv_general_dilated(
        x, w, (stride, stride), [(pad, pad), (pad, pad)],
        dimension_numbers=("NCHW", "OIHW", "NCHW"))


def _ref_bn(x, gamma, beta, eps=1e-5):
    mu = jnp.mean(x, axis=(0, 2, 3), keepdims=True)
    var = jnp.mean(jnp.square(x - mu), axis=(0, 2, 3), keepdims=True)
    xn = (x - mu) * lax.rsqrt(var + eps)
    return xn * gamma[None, :, None, None] + beta[None, :, None, None]


def reference_forward(x, p):
    lrelu = lambda t: jnp.where(t > 0, t, 0.2 * t)
    y = _ref_conv(x, p["w1"], 2, 1) + p["b1"][None, :, None, None]
    y = lrelu(y)
    y = lrelu(_ref_bn(_ref_conv(y, p["w2"], 2, 1), p["g2"], p["be2"]))
    y = lrelu(_ref_bn(_ref_conv(y, p["w3"], 2, 1), p["g3"], p["be3"]))
    y = lrelu(_ref_bn(_ref_conv(y, p["w4"], 2, 1), p["g4"], p["be4"]))
    y = _ref_conv(y, p["w5"], 2, 0) + p["b5"][None, :, None, None]
    return jax.nn.sigmoid(y)


# ----------------------------------------------------------------------------
if __name__ == "__main__":
    N, C_IMG, FD, S = 2, 3, 8, 64   # 64x64 input so the final conv yields 1x1

    key = jax.random.PRNGKey(0)
    ks = jax.random.split(key, 9)
    nrm = lambda k, shp: (0.02 * jax.random.normal(k, shp)).astype(jnp.float32)

    params = {
        "w1": nrm(ks[0], (FD, C_IMG, 4, 4)),
        "b1": nrm(ks[1], (FD,)),
        "w2": nrm(ks[2], (2 * FD, FD, 4, 4)),
        "g2": jnp.ones((2 * FD,), jnp.float32),
        "be2": jnp.zeros((2 * FD,), jnp.float32),
        "w3": nrm(ks[3], (4 * FD, 2 * FD, 4, 4)),
        "g3": jnp.ones((4 * FD,), jnp.float32),
        "be3": jnp.zeros((4 * FD,), jnp.float32),
        "w4": nrm(ks[4], (8 * FD, 4 * FD, 4, 4)),
        "g4": jnp.ones((8 * FD,), jnp.float32),
        "be4": jnp.zeros((8 * FD,), jnp.float32),
        "w5": nrm(ks[5], (1, 8 * FD, 4, 4)),
        "b5": nrm(ks[6], (1,)),
    }

    x = jax.random.normal(ks[7], (N, C_IMG, S, S), dtype=jnp.float32)

    out = jax.block_until_ready(jax.jit(discriminator_forward)(x, params))
    assert out.shape == (N, 1, 1, 1)
    assert bool(jnp.all(jnp.isfinite(out)))

    ref = jax.block_until_ready(jax.jit(reference_forward)(x, params))
    np.testing.assert_allclose(np.asarray(out), np.asarray(ref),
                               rtol=5e-2, atol=5e-2)

    print("KERNEL_OK")
</pallas_src>

<mosaic_0001>
module attributes {stable_mosaic.version = 11 : i64} {
  func.func @_gemm_bias_lrelu_kernel(%arg0: i32, %arg1: memref<8x48xbf16, #tpu.memory_space<vmem>>, %arg2: memref<48x2048xbf16, #tpu.memory_space<vmem>>, %arg3: memref<8x1xf32, #tpu.memory_space<vmem>>, %arg4: memref<8x2048xbf16, #tpu.memory_space<vmem>>) attributes {dimension_semantics = [#tpu.dimension_semantics<parallel>], iteration_bounds = array<i64: 1>, scalar_prefetch = 0 : i64, scratch_operands = 0 : i64, tpu.core_type = #tpu.core_type<tc>, window_params = [{pipeline_mode = #tpu.pipeline_mode<synchronous>, transform_indices = @transform_0, window_bounds = array<i64: 8, 48>}, {transform_indices = @transform_1, window_bounds = array<i64: 48, 2048>}, {pipeline_mode = #tpu.pipeline_mode<synchronous>, transform_indices = @transform_2, window_bounds = array<i64: 8, 1>}, {transform_indices = @transform_3, window_bounds = array<i64: 8, 2048>}]} {
    %c0 = arith.constant 0 : index
    %c0_0 = arith.constant 0 : index
    %0 = vector.load %arg1[%c0, %c0_0] : memref<8x48xbf16, #tpu.memory_space<vmem>>, vector<8x48xbf16>
    %c0_1 = arith.constant 0 : index
    %c0_2 = arith.constant 0 : index
    %1 = vector.load %arg2[%c0_1, %c0_2] : memref<48x2048xbf16, #tpu.memory_space<vmem>>, vector<48x2048xbf16>
    %cst = arith.constant dense<0.000000e+00> : vector<8x2048xf32>
    %2 = tpu.matmul %0, %1, %cst {dimension_numbers = #tpu.dot_dimension_numbers<[1], [0], [0], [1], [0, 0, 1, 1], [], []>} : vector<8x48xbf16>, vector<48x2048xbf16>, vector<8x2048xf32> -> vector<8x2048xf32>
    %c0_3 = arith.constant 0 : index
    %c0_4 = arith.constant 0 : index
    %3 = vector.load %arg3[%c0_3, %c0_4] : memref<8x1xf32, #tpu.memory_space<vmem>>, vector<8x1xf32>
    %4 = vector.broadcast %3 : vector<8x1xf32> to vector<8x2048xf32>
    %5 = arith.addf %2, %4 : vector<8x2048xf32>
    %cst_5 = arith.constant 0.000000e+00 : f32
    %6 = vector.broadcast %cst_5 : f32 to vector<8x2048xf32>
    %7 = arith.cmpf ogt, %5, %6 : vector<8x2048xf32>
    %cst_6 = arith.constant 2.000000e-01 : f32
    %8 = vector.broadcast %cst_6 : f32 to vector<8x2048xf32>
    %9 = arith.mulf %8, %5 : vector<8x2048xf32>
    %10 = arith.select %7, %5, %9 : vector<8x2048xi1>, vector<8x2048xf32>
    %11 = arith.truncf %10 : vector<8x2048xf32> to vector<8x2048xbf16>
    %c0_7 = arith.constant 0 : index
    %c0_8 = arith.constant 0 : index
    %12 = vector.load %arg4[%c0_7, %c0_8] : memref<8x2048xbf16, #tpu.memory_space<vmem>>, vector<8x2048xbf16>
    tpu.vector_store %arg4[%c0_7, %c0_8], %11 {strides = array<i32>} : memref<8x2048xbf16, #tpu.memory_space<vmem>>, vector<8x2048xbf16>,
    return
  }
  func.func @transform_0(%arg0: i32) -> (i32, i32) {
    %c0_i32 = arith.constant 0 : i32
    %c0_i32_0 = arith.constant 0 : i32
    %c0_i32_1 = arith.constant 0 : i32
    return %c0_i32, %c0_i32_0 : i32, i32
  }
  func.func @transform_1(%arg0: i32) -> (i32, i32) {
    %c0_i32 = arith.constant 0 : i32
    %c0_i32_0 = arith.constant 0 : i32
    return %c0_i32, %arg0 : i32, i32
  }
  func.func @transform_2(%arg0: i32) -> (i32, i32) {
    %c0_i32 = arith.constant 0 : i32
    %c0_i32_0 = arith.constant 0 : i32
    %c0_i32_1 = arith.constant 0 : i32
    return %c0_i32, %c0_i32_0 : i32, i32
  }
  func.func @transform_3(%arg0: i32) -> (i32, i32) {
    %c0_i32 = arith.constant 0 : i32
    %c0_i32_0 = arith.constant 0 : i32
    return %c0_i32, %arg0 : i32, i32
  }
}

module attributes {stable_mosaic.version = 11 : i64} {
  func.func @_gemm_stats_kernel(%arg0: i32, %arg1: memref<16x128xbf16, #tpu.memory_space<vmem>>, %arg2: memref<128x512xbf16, #tpu.memory_space<vmem>>, %arg3: memref<16x512xbf16, #tpu.memory_space<vmem>>, %arg4: memref<16x128xf32, #tpu.memory_space<vmem>>, %arg5: memref<16x128xf32, #tpu.memory_space<vmem>>) attributes {dimension_semantics = [#tpu.dimension_semantics<parallel>], iteration_bounds = array<i64: 1>, scalar_prefetch = 0 : i64, scratch_operands = 0 : i64, tpu.core_type = #tpu.core_type<tc>, window_params = [{pipeline_mode = #tpu.pipeline_mode<synchronous>, transform_indices = @transform_0, window_bounds = array<i64: 16, 128>}, {transform_indices = @transform_1, window_bounds = array<i64: 128, 512>}, {transform_indices = @transform_2, window_bounds = array<i64: 16, 512>}, {transform_indices = @transform_3, window_bounds = array<i64: 16, 128>}, {transform_indices = @transform_4, window_bounds = array<i64: 16, 128>}]} {
    %c0 = arith.constant 0 : index
    %c0_0 = arith.constant 0 : index
    %0 = vector.load %arg1[%c0, %c0_0] : memref<16x128xbf16, #tpu.memory_space<vmem>>, vector<16x128xbf16>
    %c0_1 = arith.constant 0 : index
    %c0_2 = arith.constant 0 : index
    %1 = vector.load %arg2[%c0_1, %c0_2] : memref<128x512xbf16, #tpu.memory_space<vmem>>, vector<128x512xbf16>
    %cst = arith.constant dense<0.000000e+00> : vector<16x512xf32>
    %2 = tpu.matmul %0, %1, %cst {dimension_numbers = #tpu.dot_dimension_numbers<[1], [0], [0], [1], [0, 0, 1, 1], [], []>} : vector<16x128xbf16>, vector<128x512xbf16>, vector<16x512xf32> -> vector<16x512xf32>
    %3 = arith.truncf %2 : vector<16x512xf32> to vector<16x512xbf16>
    %c0_3 = arith.constant 0 : index
    %c0_4 = arith.constant 0 : index
    %4 = vector.load %arg3[%c0_3, %c0_4] : memref<16x512xbf16, #tpu.memory_space<vmem>>, vector<16x512xbf16>
    tpu.vector_store %arg3[%c0_3, %c0_4], %3 {strides = array<i32>} : memref<16x512xbf16, #tpu.memory_space<vmem>>, vector<16x512xbf16>,
    %cst_5 = arith.constant dense<0.000000e+00> : vector<16xf32>
    %5 = vector.multi_reduction <add>, %2, %cst_5 [1] : vector<16x512xf32> to vector<16xf32>
    %6 = vector.shape_cast %5 : vector<16xf32> to vector<16x1xf32>
    %7 = arith.mulf %2, %2 : vector<16x512xf32>
    %cst_6 = arith.constant dense<0.000000e+00> : vector<16xf32>
    %8 = vector.multi_reduction <add>, %7, %cst_6 [1] : vector<16x512xf32> to vector<16xf32>
    %9 = vector.shape_cast %8 : vector<16xf32> to vector<16x1xf32>
    %10 = vector.shape_cast %6 : vector<16x1xf32> to vector<16x1xf32>
    %11 = vector.broadcast %10 : vector<16x1xf32> to vector<16x128xf32>
    %c0_7 = arith.constant 0 : index
    %c0_8 = arith.constant 0 : index
    %12 = vector.load %arg4[%c0_7, %c0_8] : memref<16x128xf32, #tpu.memory_space<vmem>>, vector<16x128xf32>
    tpu.vector_store %arg4[%c0_7, %c0_8], %11 {strides = array<i32>} : memref<16x128xf32, #tpu.memory_space<vmem>>, vector<16x128xf32>,
    %13 = vector.shape_cast %9 : vector<16x1xf32> to vector<16x1xf32>
    %14 = vector.broadcast %13 : vector<16x1xf32> to vector<16x128xf32>
    %c0_9 = arith.constant 0 : index
    %c0_10 = arith.constant 0 : index
    %15 = vector.load %arg5[%c0_9, %c0_10] : memref<16x128xf32, #tpu.memory_space<vmem>>, vector<16x128xf32>
    tpu.vector_store %arg5[%c0_9, %c0_10], %14 {strides = array<i32>} : memref<16x128xf32, #tpu.memory_space<vmem>>, vector<16x128xf32>,
    return
  }
  func.func @transform_0(%arg0: i32) -> (i32, i32) {
    %c0_i32 = arith.constant 0 : i32
    %c0_i32_0 = arith.constant 0 : i32
    %c0_i32_1 = arith.constant 0 : i32
    return %c0_i32, %c0_i32_0 : i32, i32
  }
  func.func @transform_1(%arg0: i32) -> (i32, i32) {
    %c0_i32 = arith.constant 0 : i32
    %c0_i32_0 = arith.constant 0 : i32
    return %c0_i32, %arg0 : i32, i32
  }
  func.func @transform_2(%arg0: i32) -> (i32, i32) {
    %c0_i32 = arith.constant 0 : i32
    %c0_i32_0 = arith.constant 0 : i32
    return %c0_i32, %arg0 : i32, i32
  }
  func.func @transform_3(%arg0: i32) -> (i32, i32) {
    %c0_i32 = arith.constant 0 : i32
    %c0_i32_0 = arith.constant 0 : i32
    return %c0_i32, %arg0 : i32, i32
  }
  func.func @transform_4(%arg0: i32) -> (i32, i32) {
    %c0_i32 = arith.constant 0 : i32
    %c0_i32_0 = arith.constant 0 : i32
    return %c0_i32, %arg0 : i32, i32
  }
}

module attributes {stable_mosaic.version = 11 : i64} {
  func.func @_bn_apply_kernel(%arg0: i32, %arg1: memref<16x512xbf16, #tpu.memory_space<vmem>>, %arg2: memref<16x1xf32, #tpu.memory_space<vmem>>, %arg3: memref<16x1xf32, #tpu.memory_space<vmem>>, %arg4: memref<16x512xbf16, #tpu.memory_space<vmem>>) attributes {dimension_semantics = [#tpu.dimension_semantics<parallel>], iteration_bounds = array<i64: 1>, scalar_prefetch = 0 : i64, scratch_operands = 0 : i64, tpu.core_type = #tpu.core_type<tc>, window_params = [{transform_indices = @transform_0, window_bounds = array<i64: 16, 512>}, {pipeline_mode = #tpu.pipeline_mode<synchronous>, transform_indices = @transform_1, window_bounds = array<i64: 16, 1>}, {pipeline_mode = #tpu.pipeline_mode<synchronous>, transform_indices = @transform_2, window_bounds = array<i64: 16, 1>}, {transform_indices = @transform_3, window_bounds = array<i64: 16, 512>}]} {
    %c0 = arith.constant 0 : index
    %c0_0 = arith.constant 0 : index
    %0 = vector.load %arg1[%c0, %c0_0] : memref<16x512xbf16, #tpu.memory_space<vmem>>, vector<16x512xbf16>
    %1 = arith.extf %0 : vector<16x512xbf16> to vector<16x512xf32>
    %c0_1 = arith.constant 0 : index
    %c0_2 = arith.constant 0 : index
    %2 = vector.load %arg2[%c0_1, %c0_2] : memref<16x1xf32, #tpu.memory_space<vmem>>, vector<16x1xf32>
    %3 = vector.broadcast %2 : vector<16x1xf32> to vector<16x512xf32>
    %4 = arith.mulf %1, %3 : vector<16x512xf32>
    %c0_3 = arith.constant 0 : index
    %c0_4 = arith.constant 0 : index
    %5 = vector.load %arg3[%c0_3, %c0_4] : memref<16x1xf32, #tpu.memory_space<vmem>>, vector<16x1xf32>
    %6 = vector.broadcast %5 : vector<16x1xf32> to vector<16x512xf32>
    %7 = arith.addf %4, %6 : vector<16x512xf32>
    %cst = arith.constant 0.000000e+00 : f32
    %8 = vector.broadcast %cst : f32 to vector<16x512xf32>
    %9 = arith.cmpf ogt, %7, %8 : vector<16x512xf32>
    %cst_5 = arith.constant 2.000000e-01 : f32
    %10 = vector.broadcast %cst_5 : f32 to vector<16x512xf32>
    %11 = arith.mulf %10, %7 : vector<16x512xf32>
    %12 = arith.select %9, %7, %11 : vector<16x512xi1>, vector<16x512xf32>
    %13 = arith.truncf %12 : vector<16x512xf32> to vector<16x512xbf16>
    %c0_6 = arith.constant 0 : index
    %c0_7 = arith.constant 0 : index
    %14 = vector.load %arg4[%c0_6, %c0_7] : memref<16x512xbf16, #tpu.memory_space<vmem>>, vector<16x512xbf16>
    tpu.vector_store %arg4[%c0_6, %c0_7], %13 {strides = array<i32>} : memref<16x512xbf16, #tpu.memory_space<vmem>>, vector<16x512xbf16>,
    return
  }
  func.func @transform_0(%arg0: i32) -> (i32, i32) {
    %c0_i32 = arith.constant 0 : i32
    %c0_i32_0 = arith.constant 0 : i32
    return %c0_i32, %arg0 : i32, i32
  }
  func.func @transform_1(%arg0: i32) -> (i32, i32) {
    %c0_i32 = arith.constant 0 : i32
    %c0_i32_0 = arith.constant 0 : i32
    %c0_i32_1 = arith.constant 0 : i32
    return %c0_i32, %c0_i32_0 : i32, i32
  }
  func.func @transform_2(%arg0: i32) -> (i32, i32) {
    %c0_i32 = arith.constant 0 : i32
    %c0_i32_0 = arith.constant 0 : i32
    %c0_i32_1 = arith.constant 0 : i32
    return %c0_i32, %c0_i32_0 : i32, i32
  }
  func.func @transform_3(%arg0: i32) -> (i32, i32) {
    %c0_i32 = arith.constant 0 : i32
    %c0_i32_0 = arith.constant 0 : i32
    return %c0_i32, %arg0 : i32, i32
  }
}

module attributes {stable_mosaic.version = 11 : i64} {
  func.func @_gemm_stats_kernel(%arg0: i32, %arg1: memref<32x256xbf16, #tpu.memory_space<vmem>>, %arg2: memref<256x128xbf16, #tpu.memory_space<vmem>>, %arg3: memref<32x128xbf16, #tpu.memory_space<vmem>>, %arg4: memref<32x128xf32, #tpu.memory_space<vmem>>, %arg5: memref<32x128xf32, #tpu.memory_space<vmem>>) attributes {dimension_semantics = [#tpu.dimension_semantics<parallel>], iteration_bounds = array<i64: 1>, scalar_prefetch = 0 : i64, scratch_operands = 0 : i64, tpu.core_type = #tpu.core_type<tc>, window_params = [{pipeline_mode = #tpu.pipeline_mode<synchronous>, transform_indices = @transform_0, window_bounds = array<i64: 32, 256>}, {transform_indices = @transform_1, window_bounds = array<i64: 256, 128>}, {transform_indices = @transform_2, window_bounds = array<i64: 32, 128>}, {transform_indices = @transform_3, window_bounds = array<i64: 32, 128>}, {transform_indices = @transform_4, window_bounds = array<i64: 32, 128>}]} {
    %c0 = arith.constant 0 : index
    %c0_0 = arith.constant 0 : index
    %0 = vector.load %arg1[%c0, %c0_0] : memref<32x256xbf16, #tpu.memory_space<vmem>>, vector<32x256xbf16>
    %c0_1 = arith.constant 0 : index
    %c0_2 = arith.constant 0 : index
    %1 = vector.load %arg2[%c0_1, %c0_2] : memref<256x128xbf16, #tpu.memory_space<vmem>>, vector<256x128xbf16>
    %cst = arith.constant dense<0.000000e+00> : vector<32x128xf32>
    %2 = tpu.matmul %0, %1, %cst {dimension_numbers = #tpu.dot_dimension_numbers<[1], [0], [0], [1], [0, 0, 1, 1], [], []>} : vector<32x256xbf16>, vector<256x128xbf16>, vector<32x128xf32> -> vector<32x128xf32>
    %3 = arith.truncf %2 : vector<32x128xf32> to vector<32x128xbf16>
    %c0_3 = arith.constant 0 : index
    %c0_4 = arith.constant 0 : index
    %4 = vector.load %arg3[%c0_3, %c0_4] : memref<32x128xbf16, #tpu.memory_space<vmem>>, vector<32x128xbf16>
    tpu.vector_store %arg3[%c0_3, %c0_4], %3 {strides = array<i32>} : memref<32x128xbf16, #tpu.memory_space<vmem>>, vector<32x128xbf16>,
    %cst_5 = arith.constant dense<0.000000e+00> : vector<32xf32>
    %5 = vector.multi_reduction <add>, %2, %cst_5 [1] : vector<32x128xf32> to vector<32xf32>
    %6 = vector.shape_cast %5 : vector<32xf32> to vector<32x1xf32>
    %7 = arith.mulf %2, %2 : vector<32x128xf32>
    %cst_6 = arith.constant dense<0.000000e+00> : vector<32xf32>
    %8 = vector.multi_reduction <add>, %7, %cst_6 [1] : vector<32x128xf32> to vector<32xf32>
    %9 = vector.shape_cast %8 : vector<32xf32> to vector<32x1xf32>
    %10 = vector.shape_cast %6 : vector<32x1xf32> to vector<32x1xf32>
    %11 = vector.broadcast %10 : vector<32x1xf32> to vector<32x128xf32>
    %c0_7 = arith.constant 0 : index
    %c0_8 = arith.constant 0 : index
    %12 = vector.load %arg4[%c0_7, %c0_8] : memref<32x128xf32, #tpu.memory_space<vmem>>, vector<32x128xf32>
    tpu.vector_store %arg4[%c0_7, %c0_8], %11 {strides = array<i32>} : memref<32x128xf32, #tpu.memory_space<vmem>>, vector<32x128xf32>,
    %13 = vector.shape_cast %9 : vector<32x1xf32> to vector<32x1xf32>
    %14 = vector.broadcast %13 : vector<32x1xf32> to vector<32x128xf32>
    %c0_9 = arith.constant 0 : index
    %c0_10 = arith.constant 0 : index
    %15 = vector.load %arg5[%c0_9, %c0_10] : memref<32x128xf32, #tpu.memory_space<vmem>>, vector<32x128xf32>
    tpu.vector_store %arg5[%c0_9, %c0_10], %14 {strides = array<i32>} : memref<32x128xf32, #tpu.memory_space<vmem>>, vector<32x128xf32>,
    return
  }
  func.func @transform_0(%arg0: i32) -> (i32, i32) {
    %c0_i32 = arith.constant 0 : i32
    %c0_i32_0 = arith.constant 0 : i32
    %c0_i32_1 = arith.constant 0 : i32
    return %c0_i32, %c0_i32_0 : i32, i32
  }
  func.func @transform_1(%arg0: i32) -> (i32, i32) {
    %c0_i32 = arith.constant 0 : i32
    %c0_i32_0 = arith.constant 0 : i32
    return %c0_i32, %arg0 : i32, i32
  }
  func.func @transform_2(%arg0: i32) -> (i32, i32) {
    %c0_i32 = arith.constant 0 : i32
    %c0_i32_0 = arith.constant 0 : i32
    return %c0_i32, %arg0 : i32, i32
  }
  func.func @transform_3(%arg0: i32) -> (i32, i32) {
    %c0_i32 = arith.constant 0 : i32
    %c0_i32_0 = arith.constant 0 : i32
    return %c0_i32, %arg0 : i32, i32
  }
  func.func @transform_4(%arg0: i32) -> (i32, i32) {
    %c0_i32 = arith.constant 0 : i32
    %c0_i32_0 = arith.constant 0 : i32
    return %c0_i32, %arg0 : i32, i32
  }
}

module attributes {stable_mosaic.version = 11 : i64} {
  func.func @_bn_apply_kernel(%arg0: i32, %arg1: memref<32x128xbf16, #tpu.memory_space<vmem>>, %arg2: memref<32x1xf32, #tpu.memory_space<vmem>>, %arg3: memref<32x1xf32, #tpu.memory_space<vmem>>, %arg4: memref<32x128xbf16, #tpu.memory_space<vmem>>) attributes {dimension_semantics = [#tpu.dimension_semantics<parallel>], iteration_bounds = array<i64: 1>, scalar_prefetch = 0 : i64, scratch_operands = 0 : i64, tpu.core_type = #tpu.core_type<tc>, window_params = [{transform_indices = @transform_0, window_bounds = array<i64: 32, 128>}, {pipeline_mode = #tpu.pipeline_mode<synchronous>, transform_indices = @transform_1, window_bounds = array<i64: 32, 1>}, {pipeline_mode = #tpu.pipeline_mode<synchronous>, transform_indices = @transform_2, window_bounds = array<i64: 32, 1>}, {transform_indices = @transform_3, window_bounds = array<i64: 32, 128>}]} {
    %c0 = arith.constant 0 : index
    %c0_0 = arith.constant 0 : index
    %0 = vector.load %arg1[%c0, %c0_0] : memref<32x128xbf16, #tpu.memory_space<vmem>>, vector<32x128xbf16>
    %1 = arith.extf %0 : vector<32x128xbf16> to vector<32x128xf32>
    %c0_1 = arith.constant 0 : index
    %c0_2 = arith.constant 0 : index
    %2 = vector.load %arg2[%c0_1, %c0_2] : memref<32x1xf32, #tpu.memory_space<vmem>>, vector<32x1xf32>
    %3 = vector.broadcast %2 : vector<32x1xf32> to vector<32x128xf32>
    %4 = arith.mulf %1, %3 : vector<32x128xf32>
    %c0_3 = arith.constant 0 : index
    %c0_4 = arith.constant 0 : index
    %5 = vector.load %arg3[%c0_3, %c0_4] : memref<32x1xf32, #tpu.memory_space<vmem>>, vector<32x1xf32>
    %6 = vector.broadcast %5 : vector<32x1xf32> to vector<32x128xf32>
    %7 = arith.addf %4, %6 : vector<32x128xf32>
    %cst = arith.constant 0.000000e+00 : f32
    %8 = vector.broadcast %cst : f32 to vector<32x128xf32>
    %9 = arith.cmpf ogt, %7, %8 : vector<32x128xf32>
    %cst_5 = arith.constant 2.000000e-01 : f32
    %10 = vector.broadcast %cst_5 : f32 to vector<32x128xf32>
    %11 = arith.mulf %10, %7 : vector<32x128xf32>
    %12 = arith.select %9, %7, %11 : vector<32x128xi1>, vector<32x128xf32>
    %13 = arith.truncf %12 : vector<32x128xf32> to vector<32x128xbf16>
    %c0_6 = arith.constant 0 : index
    %c0_7 = arith.constant 0 : index
    %14 = vector.load %arg4[%c0_6, %c0_7] : memref<32x128xbf16, #tpu.memory_space<vmem>>, vector<32x128xbf16>
    tpu.vector_store %arg4[%c0_6, %c0_7], %13 {strides = array<i32>} : memref<32x128xbf16, #tpu.memory_space<vmem>>, vector<32x128xbf16>,
    return
  }
  func.func @transform_0(%arg0: i32) -> (i32, i32) {
    %c0_i32 = arith.constant 0 : i32
    %c0_i32_0 = arith.constant 0 : i32
    return %c0_i32, %arg0 : i32, i32
  }
  func.func @transform_1(%arg0: i32) -> (i32, i32) {
    %c0_i32 = arith.constant 0 : i32
    %c0_i32_0 = arith.constant 0 : i32
    %c0_i32_1 = arith.constant 0 : i32
    return %c0_i32, %c0_i32_0 : i32, i32
  }
  func.func @transform_2(%arg0: i32) -> (i32, i32) {
    %c0_i32 = arith.constant 0 : i32
    %c0_i32_0 = arith.constant 0 : i32
    %c0_i32_1 = arith.constant 0 : i32
    return %c0_i32, %c0_i32_0 : i32, i32
  }
  func.func @transform_3(%arg0: i32) -> (i32, i32) {
    %c0_i32 = arith.constant 0 : i32
    %c0_i32_0 = arith.constant 0 : i32
    return %c0_i32, %arg0 : i32, i32
  }
}

module attributes {stable_mosaic.version = 11 : i64} {
  func.func @_gemm_stats_kernel(%arg0: i32, %arg1: memref<64x512xbf16, #tpu.memory_space<vmem>>, %arg2: memref<512x128xbf16, #tpu.memory_space<vmem>>, %arg3: memref<64x128xbf16, #tpu.memory_space<vmem>>, %arg4: memref<64x128xf32, #tpu.memory_space<vmem>>, %arg5: memref<64x128xf32, #tpu.memory_space<vmem>>) attributes {dimension_semantics = [#tpu.dimension_semantics<parallel>], iteration_bounds = array<i64: 1>, scalar_prefetch = 0 : i64, scratch_operands = 0 : i64, tpu.core_type = #tpu.core_type<tc>, window_params = [{pipeline_mode = #tpu.pipeline_mode<synchronous>, transform_indices = @transform_0, window_bounds = array<i64: 64, 512>}, {transform_indices = @transform_1, window_bounds = array<i64: 512, 128>}, {transform_indices = @transform_2, window_bounds = array<i64: 64, 128>}, {transform_indices = @transform_3, window_bounds = array<i64: 64, 128>}, {transform_indices = @transform_4, window_bounds = array<i64: 64, 128>}]} {
    %c0 = arith.constant 0 : index
    %c0_0 = arith.constant 0 : index
    %0 = vector.load %arg1[%c0, %c0_0] : memref<64x512xbf16, #tpu.memory_space<vmem>>, vector<64x512xbf16>
    %c0_1 = arith.constant 0 : index
    %c0_2 = arith.constant 0 : index
    %1 = vector.load %arg2[%c0_1, %c0_2] : memref<512x128xbf16, #tpu.memory_space<vmem>>, vector<512x128xbf16>
    %cst = arith.constant dense<0.000000e+00> : vector<64x128xf32>
    %2 = tpu.matmul %0, %1, %cst {dimension_numbers = #tpu.dot_dimension_numbers<[1], [0], [0], [1], [0, 0, 1, 1], [], []>} : vector<64x512xbf16>, vector<512x128xbf16>, vector<64x128xf32> -> vector<64x128xf32>
    %3 = arith.truncf %2 : vector<64x128xf32> to vector<64x128xbf16>
    %c0_3 = arith.constant 0 : index
    %c0_4 = arith.constant 0 : index
    %4 = vector.load %arg3[%c0_3, %c0_4] : memref<64x128xbf16, #tpu.memory_space<vmem>>, vector<64x128xbf16>
    tpu.vector_store %arg3[%c0_3, %c0_4], %3 {strides = array<i32>} : memref<64x128xbf16, #tpu.memory_space<vmem>>, vector<64x128xbf16>,
    %cst_5 = arith.constant dense<0.000000e+00> : vector<64xf32>
    %5 = vector.multi_reduction <add>, %2, %cst_5 [1] : vector<64x128xf32> to vector<64xf32>
    %6 = vector.shape_cast %5 : vector<64xf32> to vector<64x1xf32>
    %7 = arith.mulf %2, %2 : vector<64x128xf32>
    %cst_6 = arith.constant dense<0.000000e+00> : vector<64xf32>
    %8 = vector.multi_reduction <add>, %7, %cst_6 [1] : vector<64x128xf32> to vector<64xf32>
    %9 = vector.shape_cast %8 : vector<64xf32> to vector<64x1xf32>
    %10 = vector.shape_cast %6 : vector<64x1xf32> to vector<64x1xf32>
    %11 = vector.broadcast %10 : vector<64x1xf32> to vector<64x128xf32>
    %c0_7 = arith.constant 0 : index
    %c0_8 = arith.constant 0 : index
    %12 = vector.load %arg4[%c0_7, %c0_8] : memref<64x128xf32, #tpu.memory_space<vmem>>, vector<64x128xf32>
    tpu.vector_store %arg4[%c0_7, %c0_8], %11 {strides = array<i32>} : memref<64x128xf32, #tpu.memory_space<vmem>>, vector<64x128xf32>,
    %13 = vector.shape_cast %9 : vector<64x1xf32> to vector<64x1xf32>
    %14 = vector.broadcast %13 : vector<64x1xf32> to vector<64x128xf32>
    %c0_9 = arith.constant 0 : index
    %c0_10 = arith.constant 0 : index
    %15 = vector.load %arg5[%c0_9, %c0_10] : memref<64x128xf32, #tpu.memory_space<vmem>>, vector<64x128xf32>
    tpu.vector_store %arg5[%c0_9, %c0_10], %14 {strides = array<i32>} : memref<64x128xf32, #tpu.memory_space<vmem>>, vector<64x128xf32>,
    return
  }
  func.func @transform_0(%arg0: i32) -> (i32, i32) {
    %c0_i32 = arith.constant 0 : i32
    %c0_i32_0 = arith.constant 0 : i32
    %c0_i32_1 = arith.constant 0 : i32
    return %c0_i32, %c0_i32_0 : i32, i32
  }
  func.func @transform_1(%arg0: i32) -> (i32, i32) {
    %c0_i32 = arith.constant 0 : i32
    %c0_i32_0 = arith.constant 0 : i32
    return %c0_i32, %arg0 : i32, i32
  }
  func.func @transform_2(%arg0: i32) -> (i32, i32) {
    %c0_i32 = arith.constant 0 : i32
    %c0_i32_0 = arith.constant 0 : i32
    return %c0_i32, %arg0 : i32, i32
  }
  func.func @transform_3(%arg0: i32) -> (i32, i32) {
    %c0_i32 = arith.constant 0 : i32
    %c0_i32_0 = arith.constant 0 : i32
    return %c0_i32, %arg0 : i32, i32
  }
  func.func @transform_4(%arg0: i32) -> (i32, i32) {
    %c0_i32 = arith.constant 0 : i32
    %c0_i32_0 = arith.constant 0 : i32
    return %c0_i32, %arg0 : i32, i32
  }
}

module attributes {stable_mosaic.version = 11 : i64} {
  func.func @_bn_apply_kernel(%arg0: i32, %arg1: memref<64x128xbf16, #tpu.memory_space<vmem>>, %arg2: memref<64x1xf32, #tpu.memory_space<vmem>>, %arg3: memref<64x1xf32, #tpu.memory_space<vmem>>, %arg4: memref<64x128xbf16, #tpu.memory_space<vmem>>) attributes {dimension_semantics = [#tpu.dimension_semantics<parallel>], iteration_bounds = array<i64: 1>, scalar_prefetch = 0 : i64, scratch_operands = 0 : i64, tpu.core_type = #tpu.core_type<tc>, window_params = [{transform_indices = @transform_0, window_bounds = array<i64: 64, 128>}, {pipeline_mode = #tpu.pipeline_mode<synchronous>, transform_indices = @transform_1, window_bounds = array<i64: 64, 1>}, {pipeline_mode = #tpu.pipeline_mode<synchronous>, transform_indices = @transform_2, window_bounds = array<i64: 64, 1>}, {transform_indices = @transform_3, window_bounds = array<i64: 64, 128>}]} {
    %c0 = arith.constant 0 : index
    %c0_0 = arith.constant 0 : index
    %0 = vector.load %arg1[%c0, %c0_0] : memref<64x128xbf16, #tpu.memory_space<vmem>>, vector<64x128xbf16>
    %1 = arith.extf %0 : vector<64x128xbf16> to vector<64x128xf32>
    %c0_1 = arith.constant 0 : index
    %c0_2 = arith.constant 0 : index
    %2 = vector.load %arg2[%c0_1, %c0_2] : memref<64x1xf32, #tpu.memory_space<vmem>>, vector<64x1xf32>
    %3 = vector.broadcast %2 : vector<64x1xf32> to vector<64x128xf32>
    %4 = arith.mulf %1, %3 : vector<64x128xf32>
    %c0_3 = arith.constant 0 : index
    %c0_4 = arith.constant 0 : index
    %5 = vector.load %arg3[%c0_3, %c0_4] : memref<64x1xf32, #tpu.memory_space<vmem>>, vector<64x1xf32>
    %6 = vector.broadcast %5 : vector<64x1xf32> to vector<64x128xf32>
    %7 = arith.addf %4, %6 : vector<64x128xf32>
    %cst = arith.constant 0.000000e+00 : f32
    %8 = vector.broadcast %cst : f32 to vector<64x128xf32>
    %9 = arith.cmpf ogt, %7, %8 : vector<64x128xf32>
    %cst_5 = arith.constant 2.000000e-01 : f32
    %10 = vector.broadcast %cst_5 : f32 to vector<64x128xf32>
    %11 = arith.mulf %10, %7 : vector<64x128xf32>
    %12 = arith.select %9, %7, %11 : vector<64x128xi1>, vector<64x128xf32>
    %13 = arith.truncf %12 : vector<64x128xf32> to vector<64x128xbf16>
    %c0_6 = arith.constant 0 : index
    %c0_7 = arith.constant 0 : index
    %14 = vector.load %arg4[%c0_6, %c0_7] : memref<64x128xbf16, #tpu.memory_space<vmem>>, vector<64x128xbf16>
    tpu.vector_store %arg4[%c0_6, %c0_7], %13 {strides = array<i32>} : memref<64x128xbf16, #tpu.memory_space<vmem>>, vector<64x128xbf16>,
    return
  }
  func.func @transform_0(%arg0: i32) -> (i32, i32) {
    %c0_i32 = arith.constant 0 : i32
    %c0_i32_0 = arith.constant 0 : i32
    return %c0_i32, %arg0 : i32, i32
  }
  func.func @transform_1(%arg0: i32) -> (i32, i32) {
    %c0_i32 = arith.constant 0 : i32
    %c0_i32_0 = arith.constant 0 : i32
    %c0_i32_1 = arith.constant 0 : i32
    return %c0_i32, %c0_i32_0 : i32, i32
  }
  func.func @transform_2(%arg0: i32) -> (i32, i32) {
    %c0_i32 = arith.constant 0 : i32
    %c0_i32_0 = arith.constant 0 : i32
    %c0_i32_1 = arith.constant 0 : i32
    return %c0_i32, %c0_i32_0 : i32, i32
  }
  func.func @transform_3(%arg0: i32) -> (i32, i32) {
    %c0_i32 = arith.constant 0 : i32
    %c0_i32_0 = arith.constant 0 : i32
    return %c0_i32, %arg0 : i32, i32
  }
}

</mosaic_0001>

<bundles_post_ra>
// kernel: discriminator_forward.7
= control target key start
LH: loop header
LB: loop body
LE: loop exit
PB: predicated region body
PF: predicated region fallthrough
CT: control target
= control target key end

     0   :  { %v848_v3 = vmov 0   ;;  %vm310_vm0 = vcmask 392192   ;;  %s1239_s1 = inlined_call_operand.vmem [shape: bf16[48,2048], index: 1, kind: input, shape index: {}]   ;;  %s1240_s0 = inlined_call_operand.vmem [shape: bf16[8,48], index: 0, kind: input, shape index: {}]   ;;  %s1241_s2 = inlined_call_operand.vmem [shape: f32[8,1], index: 2, kind: input, shape index: {}]   ;;  %s1242_s3 = inlined_call_operand.vmem [shape: bf16[8,2048], index: 3, kind: output, shape index: {}]  }
   0x1   :  { %v720_v0 = vld [vmem:[%s1239_s1 + $0x100] sm:$0xf]  ;;  %v830_v2 = vld [vmem:[%s1239_s1 + $0x104] sm:$0xf]  ;;  %847 = vset.pattern.permute.xlu0 %v848_v3  ;;  %v728_v6 = vld [vmem:[%s1239_s1 + $0x108] sm:$0xf] }
   0x2   :  { %v838_v1 = vld [vmem:[%s1239_s1 + $0x13c] sm:$0xf0]  ;;  %v722_v5 = vld [vmem:[%s1239_s1 + $0x140] sm:$0xf0]  ;;  %v839_v7 = vld [vmem:[%s1239_s1 + $0x144] sm:$0xf0] }
   0x3   :  { %v721_v4 = vor.u32 %v838_v1, %v720_v0  ;;  %v725_v8 = vor.u32 %v830_v2, %v722_v5  ;;  %v729_v9 = vor.u32 %v839_v7, %v728_v6  ;;  %v831_v10 = vld [vmem:[%s1239_s1 + $0x10c] sm:$0xf]  ;;  %v656_v12 = vld [vmem:[%s1239_s1 + $0x80] sm:$0xf]  ;;  %v814_v15 = vld [vmem:[%s1239_s1 + $0x84] sm:$0xf] }
   0x4   :  { %v730_v11 = vld [vmem:[%s1239_s1 + $0x148] sm:$0xf0]  ;;  %v822_v14 = vld [vmem:[%s1239_s1 + $0xbc] sm:$0xf0]  ;;  %v658_v16 = vld [vmem:[%s1239_s1 + $0xc0] sm:$0xf0] }
   0x5   :  { %319 = vmatpush.bf16.msra.mxu0 %v721_v4  ;;  %v733_v13 = vor.u32 %v831_v10, %v730_v11  ;;  %332 = vmatpush.bf16.msra.mxu1 %v725_v8  ;;  %v657_v17 = vor.u32 %v822_v14, %v656_v12  ;;  %v661_v18 = vor.u32 %v814_v15, %v658_v16  ;;  %v664_v19 = vld [vmem:[%s1239_s1 + $0x88] sm:$0xf]  ;;  %v815_v21 = vld [vmem:[%s1239_s1 + $0x8c] sm:$0xf]  ;;  %v592_v24 = vld [vmem:[%s1239_s1] sm:$0xf] }
   0x6   :  { %345 = vmatpush.bf16.msra.mxu2 %v729_v9  ;;  %v823_v20 = vld [vmem:[%s1239_s1 + $0xc4] sm:$0xf0]  ;;  %v666_v23 = vld [vmem:[%s1239_s1 + $0xc8] sm:$0xf0]  ;;  %v806_v25 = vld [vmem:[%s1239_s1 + $0x3c] sm:$0xf0] }
   0x7   :  { %358 = vmatpush.bf16.msra.mxu3 %v733_v13  ;;  %v665_v22 = vor.u32 %v823_v20, %v664_v19  ;;  %v669_v26 = vor.u32 %v815_v21, %v666_v23  ;;  %v798_v27 = vld [vmem:[%s1239_s1 + $0x4] sm:$0xf]  ;;  %v600_v29 = vld [vmem:[%s1239_s1 + $0x8] sm:$0xf]  ;;  %v593_v30 = vor.u32 %v806_v25, %v592_v24  ;;  %v799_v32 = vld [vmem:[%s1239_s1 + $0xc] sm:$0xf] }
   0x8   :  { %v594_v28 = vld [vmem:[%s1239_s1 + $0x40] sm:$0xf0]  ;;  %v807_v31 = vld [vmem:[%s1239_s1 + $0x44] sm:$0xf0]  ;;  %v602_v33 = vld [vmem:[%s1239_s1 + $0x48] sm:$0xf0] }
   0x9   :  { %320 = vmatpush.bf16.msra.mxu0 %v657_v17  ;;  %333 = vmatpush.bf16.msra.mxu1 %v661_v18  ;;  %v597_v34 = vor.u32 %v798_v27, %v594_v28  ;;  %v601_v35 = vor.u32 %v807_v31, %v600_v29  ;;  %v744_v36 = vld [vmem:[%s1239_s1 + $0x118] sm:$0xf]  ;;  %v605_v38 = vor.u32 %v799_v32, %v602_v33  ;;  %v950_v39 = vld [vmem:[%s1240_s0] sm:$0xf]  ;;  %v833_v41 = vld [vmem:[%s1239_s1 + $0x11c] sm:$0xf] }
   0xa   :  { %346 = vmatpush.bf16.msra.mxu2 %v665_v22  ;;  %v841_v37 = vld [vmem:[%s1239_s1 + $0x154] sm:$0xf0]  ;;  %v746_v42 = vld [vmem:[%s1239_s1 + $0x158] sm:$0xf0]  ;;  %v736_v43 = vld [vmem:[%s1239_s1 + $0x110] sm:$0xf] }
   0xb   :  { %359 = vmatpush.bf16.msra.mxu3 %v669_v26  ;;  %v745_v40 = vor.u32 %v841_v37, %v744_v36  ;;  %v749_v44 = vor.u32 %v833_v41, %v746_v42  ;;  %v840_v45 = vld [vmem:[%s1239_s1 + $0x14c] sm:$0xf0]  ;;  %v832_v46 = vld [vmem:[%s1239_s1 + $0x114] sm:$0xf]  ;;  %v680_v48 = vld [vmem:[%s1239_s1 + $0x98] sm:$0xf] }
   0xc   :  { %v738_v47 = vld [vmem:[%s1239_s1 + $0x150] sm:$0xf0]  ;;  %v825_v49 = vld [vmem:[%s1239_s1 + $0xd4] sm:$0xf0]  ;;  %v817_v50 = vld [vmem:[%s1239_s1 + $0x9c] sm:$0xf]  ;;  %v737_v51 = vor.u32 %v840_v45, %v736_v43 }
   0xd   :  { %321 = vmatpush.bf16.msra.mxu0 %v593_v30  ;;  %334 = vmatpush.bf16.msra.mxu1 %v597_v34  ;;  %v682_v52 = vld [vmem:[%s1239_s1 + $0xd8] sm:$0xf0]  ;;  %v672_v53 = vld [vmem:[%s1239_s1 + $0x90] sm:$0xf]  ;;  %v741_v54 = vor.u32 %v832_v46, %v738_v47  ;;  %v681_v55 = vor.u32 %v825_v49, %v680_v48  ;;  %v816_v57 = vld [vmem:[%s1239_s1 + $0x94] sm:$0xf] }
   0xe   :  { %347 = vmatpush.bf16.msra.mxu2 %v601_v35  ;;  %v824_v56 = vld [vmem:[%s1239_s1 + $0xcc] sm:$0xf0]  ;;  %v674_v58 = vld [vmem:[%s1239_s1 + $0xd0] sm:$0xf0]  ;;  %v685_v59 = vor.u32 %v817_v50, %v682_v52  ;;  %v616_v60 = vld [vmem:[%s1239_s1 + $0x18] sm:$0xf] }
   0xf   :  { %360 = vmatpush.bf16.msra.mxu3 %v605_v38  ;;  %v809_v61 = vld [vmem:[%s1239_s1 + $0x54] sm:$0xf0]  ;;  %v801_v62 = vld [vmem:[%s1239_s1 + $0x1c] sm:$0xf]  ;;  %v608_v0 = vld [vmem:[%s1239_s1 + $0x10] sm:$0xf]  ;;  %v673_v2 = vor.u32 %v824_v56, %v672_v53  ;;  %v677_v7 = vor.u32 %v816_v57, %v674_v58 }
  0x10   :  { %782 = vmatmul.msk.bf16.vlgmr.msra.gmra.mxu0 %vm310_vm0, %v950_v39  ;;  %783 = vmatmul.msk.bf16.vlgmr.msra.gmra.mxu1 %vm310_vm0, %v950_v39  ;;  %v618_v63 = vld [vmem:[%s1239_s1 + $0x58] sm:$0xf0]  ;;  %v808_v1 = vld [vmem:[%s1239_s1 + $0x4c] sm:$0xf0]  ;;  %v800_v3 = vld [vmem:[%s1239_s1 + $0x14] sm:$0xf]  ;;  %v617_v8 = vor.u32 %v809_v61, %v616_v60 }
  0x11   :  { %784 = vmatmul.msk.bf16.vlgmr.msra.gmra.mxu2 %vm310_vm0, %v950_v39  ;;  %371 = vmatpush.bf16.msrb.mxu0 %v737_v51  ;;  %v610_v4 = vld [vmem:[%s1239_s1 + $0x50] sm:$0xf0]  ;;  %v64_v5 = vld [vmem:[%s1241_s2] sm:$0xff]  ;;  %v760_v6 = vld [vmem:[%s1239_s1 + $0x128] sm:$0xf]  ;;  %v621_v12 = vor.u32 %v801_v62, %v618_v63  ;;  %v609_v21 = vor.u32 %v808_v1, %v608_v0 }
  0x12   :  { %397 = vmatpush.bf16.msrb.mxu2 %v745_v40  ;;  %785 = vmatmul.msk.bf16.vlgmr.msra.gmra.mxu3 %vm310_vm0, %v950_v39  ;;  %v843_v9 = vld [vmem:[%s1239_s1 + $0x164] sm:$0xf0]  ;;  %v835_v10 = vld [vmem:[%s1239_s1 + $0x12c] sm:$0xf]  ;;  %v752_v14 = vld [vmem:[%s1239_s1 + $0x120] sm:$0xf]  ;;  %v613_v24 = vor.u32 %v800_v3, %v610_v4 }
  0x13   :  { %410 = vmatpush.bf16.msrb.mxu3 %v749_v44  ;;  %384 = vmatpush.bf16.msrb.mxu1 %v741_v54  ;;  %v762_v11 = vld [vmem:[%s1239_s1 + $0x168] sm:$0xf0]  ;;  %v761_v13 = vor.u32 %v843_v9, %v760_v6  ;;  %v842_v15 = vld [vmem:[%s1239_s1 + $0x15c] sm:$0xf0]  ;;  %v834_v16 = vld [vmem:[%s1239_s1 + $0x124] sm:$0xf] }
  0x14   :  { %67 = vperm.xlu0 %847, %v64_v5   ;;  %v765_v17 = vor.u32 %v835_v10, %v762_v11  ;;  %v754_v18 = vld [vmem:[%s1239_s1 + $0x160] sm:$0xf0]  ;;  %v696_v19 = vld [vmem:[%s1239_s1 + $0xa8] sm:$0xf]  ;;  %v819_v22 = vld [vmem:[%s1239_s1 + $0xac] sm:$0xf]  ;;  %v753_v25 = vor.u32 %v842_v15, %v752_v14 }
  0x15   :  { %v827_v20 = vld [vmem:[%s1239_s1 + $0xe4] sm:$0xf0]  ;;  %372 = vmatpush.bf16.msrb.mxu0 %v673_v2  ;;  %v698_v23 = vld [vmem:[%s1239_s1 + $0xe8] sm:$0xf0]  ;;  %v757_v26 = vor.u32 %v834_v16, %v754_v18  ;;  %v688_v28 = vld [vmem:[%s1239_s1 + $0xa0] sm:$0xf] }
  0x16   :  { %398 = vmatpush.bf16.msrb.mxu2 %v681_v55  ;;  %v697_v27 = vor.u32 %v827_v20, %v696_v19  ;;  %v826_v29 = vld [vmem:[%s1239_s1 + $0xdc] sm:$0xf0]  ;;  %v701_v30 = vor.u32 %v819_v22, %v698_v23  ;;  %v818_v31 = vld [vmem:[%s1239_s1 + $0xa4] sm:$0xf]  ;;  %v632_v33 = vld [vmem:[%s1239_s1 + $0x28] sm:$0xf] }
  0x17   :  { %411 = vmatpush.bf16.msrb.mxu3 %v685_v59  ;;  %385 = vmatpush.bf16.msrb.mxu1 %v677_v7  ;;  %v690_v32 = vld [vmem:[%s1239_s1 + $0xe0] sm:$0xf0]  ;;  %v811_v34 = vld [vmem:[%s1239_s1 + $0x64] sm:$0xf0]  ;;  %v689_v35 = vor.u32 %v826_v29, %v688_v28  ;;  %v803_v36 = vld [vmem:[%s1239_s1 + $0x2c] sm:$0xf] }
  0x18   :  { %v634_v37 = vld [vmem:[%s1239_s1 + $0x68] sm:$0xf0]  ;;  %v624_v38 = vld [vmem:[%s1239_s1 + $0x20] sm:$0xf]  ;;  %v693_v40 = vor.u32 %v818_v31, %v690_v32  ;;  %v802_v42 = vld [vmem:[%s1239_s1 + $0x24] sm:$0xf]  ;;  %v633_v47 = vor.u32 %v811_v34, %v632_v33 }
  0x19   :  { %373 = vmatpush.bf16.msrb.mxu0 %v609_v21  ;;  %v810_v41 = vld [vmem:[%s1239_s1 + $0x5c] sm:$0xf0]  ;;  %v626_v43 = vld [vmem:[%s1239_s1 + $0x60] sm:$0xf0]  ;;  %v776_v44 = vld [vmem:[%s1239_s1 + $0x138] sm:$0xf]  ;;  %v637_v51 = vor.u32 %v803_v36, %v634_v37 }
  0x1a   :  { %399 = vmatpush.bf16.msrb.mxu2 %v617_v8  ;;  %v845_v45 = vld [vmem:[%s1239_s1 + $0x174] sm:$0xf0]  ;;  %v837_v46 = vld [vmem:[%s1239_s1 + $0x13c] sm:$0xf]  ;;  %v768_v49 = vld [vmem:[%s1239_s1 + $0x130] sm:$0xf]  ;;  %v625_v52 = vor.u32 %v810_v41, %v624_v38  ;;  %v629_v55 = vor.u32 %v802_v42, %v626_v43 }
  0x1b   :  { %412 = vmatpush.bf16.msrb.mxu3 %v621_v12  ;;  %386 = vmatpush.bf16.msrb.mxu1 %v613_v24  ;;  %v778_v48 = vld [vmem:[%s1239_s1 + $0x178] sm:$0xf0]  ;;  %v844_v50 = vld [vmem:[%s1239_s1 + $0x16c] sm:$0xf0]  ;;  %v836_v53 = vld [vmem:[%s1239_s1 + $0x134] sm:$0xf]  ;;  %v777_v56 = vor.u32 %v845_v45, %v776_v44 }
  0x1c   :  { %v770_v54 = vld [vmem:[%s1239_s1 + $0x170] sm:$0xf0]  ;;  %v781_v57 = vor.u32 %v837_v46, %v778_v48  ;;  %v769_v58 = vor.u32 %v844_v50, %v768_v49  ;;  %v712_v59 = vld [vmem:[%s1239_s1 + $0xb8] sm:$0xf]  ;;  %v821_v61 = vld [vmem:[%s1239_s1 + $0xbc] sm:$0xf] }
  0x1d   :  { %423 = vmatpush.bf16.msra.mxu0 %v753_v25  ;;  %v829_v60 = vld [vmem:[%s1239_s1 + $0xf4] sm:$0xf0]  ;;  %v773_v62 = vor.u32 %v836_v53, %v770_v54  ;;  %v714_v63 = vld [vmem:[%s1239_s1 + $0xf8] sm:$0xf0]  ;;  %v704_v0 = vld [vmem:[%s1239_s1 + $0xb0] sm:$0xf] }
  0x1e   :  { %449 = vmatpush.bf16.msra.mxu2 %v761_v13  ;;  %v828_v1 = vld [vmem:[%s1239_s1 + $0xec] sm:$0xf0]  ;;  %v820_v2 = vld [vmem:[%s1239_s1 + $0xb4] sm:$0xf]  ;;  %v713_v4 = vor.u32 %v829_v60, %v712_v59  ;;  %v717_v5 = vor.u32 %v821_v61, %v714_v63  ;;  %v648_v7 = vld [vmem:[%s1239_s1 + $0x38] sm:$0xf] }
  0x1f   :  { %462 = vmatpush.bf16.msra.mxu3 %v765_v17  ;;  %436 = vmatpush.bf16.msra.mxu1 %v757_v26  ;;  %v706_v3 = vld [vmem:[%s1239_s1 + $0xf0] sm:$0xf0]  ;;  %v705_v6 = vor.u32 %v828_v1, %v704_v0  ;;  %v813_v8 = vld [vmem:[%s1239_s1 + $0x74] sm:$0xf0]  ;;  %v805_v9 = vld [vmem:[%s1239_s1 + $0x3c] sm:$0xf] }
  0x20   :  { %786 = vmatmul.msk.bf16.vlgmr.msrb.gmra.mxu0 %vm310_vm0, %v950_v39  ;;  %787 = vmatmul.msk.bf16.vlgmr.msrb.gmra.mxu1 %vm310_vm0, %v950_v39  ;;  %v709_v10 = vor.u32 %v820_v2, %v706_v3  ;;  %v650_v11 = vld [vmem:[%s1239_s1 + $0x78] sm:$0xf0]  ;;  %v640_v12 = vld [vmem:[%s1239_s1 + $0x30] sm:$0xf]  ;;  %v804_v14 = vld [vmem:[%s1239_s1 + $0x34] sm:$0xf]  ;;  %v649_v16 = vor.u32 %v813_v8, %v648_v7 }
  0x21   :  { %424 = vmatpush.bf16.msra.mxu0 %v689_v35  ;;  %788 = vmatmul.msk.bf16.vlgmr.msrb.gmra.mxu2 %vm310_vm0, %v950_v39  ;;  %v812_v13 = vld [vmem:[%s1239_s1 + $0x6c] sm:$0xf0]  ;;  %v642_v15 = vld [vmem:[%s1239_s1 + $0x70] sm:$0xf0]  ;;  %v653_v17 = vor.u32 %v805_v9, %v650_v11 }
  0x22   :  { %450 = vmatpush.bf16.msra.mxu2 %v697_v27  ;;  %789 = vmatmul.msk.bf16.vlgmr.msrb.gmra.mxu3 %vm310_vm0, %v950_v39  ;;  %v641_v18 = vor.u32 %v812_v13, %v640_v12  ;;  %v645_v19 = vor.u32 %v804_v14, %v642_v15 }
  0x23   :  { %463 = vmatpush.bf16.msra.mxu3 %v701_v30  ;;  %437 = vmatpush.bf16.msra.mxu1 %v693_v40 }
  0x25   :  { %425 = vmatpush.bf16.msra.mxu0 %v625_v52 }
  0x26   :  { %451 = vmatpush.bf16.msra.mxu2 %v633_v47 }
  0x27   :  { %464 = vmatpush.bf16.msra.mxu3 %v637_v51  ;;  %438 = vmatpush.bf16.msra.mxu1 %v629_v55 }
  0x29   :  { %475 = vmatpush.bf16.msrb.mxu0 %v769_v58 }
  0x2a   :  { %501 = vmatpush.bf16.msrb.mxu2 %v777_v56 }
  0x2b   :  { %514 = vmatpush.bf16.msrb.mxu3 %v781_v57  ;;  %488 = vmatpush.bf16.msrb.mxu1 %v773_v62 }
  0x2d   :  { %476 = vmatpush.bf16.msrb.mxu0 %v705_v6 }
  0x2e   :  { %502 = vmatpush.bf16.msrb.mxu2 %v713_v4 }
  0x2f   :  { %515 = vmatpush.bf16.msrb.mxu3 %v717_v5  ;;  %489 = vmatpush.bf16.msrb.mxu1 %v709_v10 }
  0x30   :  { %790 = vmatmul.msk.bf16.vlgmr.msra.gmra.mxu0 %vm310_vm0, %v950_v39  ;;  %791 = vmatmul.msk.bf16.vlgmr.msra.gmra.mxu1 %vm310_vm0, %v950_v39 }
  0x31   :  { %477 = vmatpush.bf16.msrb.mxu0 %v641_v18  ;;  %792 = vmatmul.msk.bf16.vlgmr.msra.gmra.mxu2 %vm310_vm0, %v950_v39 }
  0x32   :  { %503 = vmatpush.bf16.msrb.mxu2 %v649_v16  ;;  %793 = vmatmul.msk.bf16.vlgmr.msra.gmra.mxu3 %vm310_vm0, %v950_v39 }
  0x33   :  { %516 = vmatpush.bf16.msrb.mxu3 %v653_v17  ;;  %490 = vmatpush.bf16.msrb.mxu1 %v645_v19 }
  0x40   :  { %794 = vmatmul.msk.bf16.vlgmr.msrb.gmra.mxu0 %vm310_vm0, %v950_v39  ;;  %795 = vmatmul.msk.bf16.vlgmr.msrb.gmra.mxu1 %vm310_vm0, %v950_v39 }
  0x41   :  { %796 = vmatmul.msk.bf16.vlgmr.msrb.gmra.mxu2 %vm310_vm0, %v950_v39 }
  0x42   :  { %797 = vmatmul.msk.bf16.vlgmr.msrb.gmra.mxu3 %vm310_vm0, %v950_v39 }
  0x86   :  { %v1197_v20 = vpop.permute.xlu0 %67 }
  0x8d   :  { %v323_v21 = vpop.f32.mrf.mxu0  ;;  %v336_v22 = vpop.f32.mrf.mxu1 }
  0x8e   :  { %v324_v23 = vadd.f32 %v323_v21, %v1197_v20  ;;  %v337_v24 = vadd.f32 %v336_v22, %v1197_v20 }
  0x90   :  { %vm522_vm1 = vcmp.gt.f32.partialorder %v324_v23, 0.0  ;;  %v538_v25 = vmul.f32 0.2, %v324_v23  ;;  %vm523_vm2 = vcmp.gt.f32.partialorder %v337_v24, 0.0  ;;  %v539_v26 = vmul.f32 0.2, %v337_v24 }
  0x92   :  { %v554_v27 = vsel %vm522_vm1, %v324_v23, %v538_v25  ;;  %v555_v28 = vsel %vm523_vm2, %v337_v24, %v539_v26 }
  0x93   :  { %v570_v30 = vpack.c.bf16 %v555_v28, %v554_v27 }
  0x94   :  { %v349_v29 = vpop.f32.mrf.mxu2 }
  0x95   :  { %v350_v31 = vadd.f32 %v349_v29, %v1197_v20  ;;  %v362_v32 = vpop.f32.mrf.mxu3  ;;  %v325_v39 = vpop.f32.mrf.mxu0  ;;  %578 = vst [vmem:[%s1242_s3] sm:$0xff] %v570_v30 }
  0x96   :  { %v363_v33 = vadd.f32 %v362_v32, %v1197_v20  ;;  %v338_v34 = vpop.f32.mrf.mxu1 }
  0x97   :  { %vm524_vm3 = vcmp.gt.f32.partialorder %v350_v31, 0.0  ;;  %v540_v35 = vmul.f32 0.2, %v350_v31 }
  0x98   :  { %vm525_vm4 = vcmp.gt.f32.partialorder %v363_v33, 0.0  ;;  %v541_v36 = vmul.f32 0.2, %v363_v33 }
  0x99   :  { %v556_v37 = vsel %vm524_vm3, %v350_v31, %v540_v35 }
  0x9a   :  { %v557_v38 = vsel %vm525_vm4, %v363_v33, %v541_v36 }
  0x9b   :  { %v571_v40 = vpack.c.bf16 %v557_v38, %v556_v37 }
  0x9c   :  { %v351_v41 = vpop.f32.mrf.mxu2 }
  0x9d   :  { %579 = vst [vmem:[%s1242_s3 + $0x8] sm:$0xff] %v571_v40  ;;  %v364_v42 = vpop.f32.mrf.mxu3  ;;  %v375_v43 = vpop.f32.mrf.mxu0 }
  0x9e   :  { %v376_v44 = vadd.f32 %v375_v43, %v1197_v20  ;;  %v388_v45 = vpop.f32.mrf.mxu1 }
  0x9f   :  { %v389_v46 = vadd.f32 %v388_v45, %v1197_v20 }
  0xa0   :  { %vm526_vm5 = vcmp.gt.f32.partialorder %v376_v44, 0.0  ;;  %v542_v47 = vmul.f32 0.2, %v376_v44 }
  0xa1   :  { %vm527_vm6 = vcmp.gt.f32.partialorder %v389_v46, 0.0  ;;  %v543_v48 = vmul.f32 0.2, %v389_v46 }
  0xa2   :  { %v558_v49 = vsel %vm526_vm5, %v376_v44, %v542_v47 }
  0xa3   :  { %v559_v50 = vsel %vm527_vm6, %v389_v46, %v543_v48 }
  0xa4   :  { %v572_v51 = vpack.c.bf16 %v559_v50, %v558_v49  ;;  %v401_v52 = vpop.f32.mrf.mxu2 }
  0xa5   :  { %v402_v53 = vadd.f32 %v401_v52, %v1197_v20  ;;  %v414_v54 = vpop.f32.mrf.mxu3  ;;  %v377_v55 = vpop.f32.mrf.mxu0 }
  0xa6   :  { %580 = vst [vmem:[%s1242_s3 + $0x10] sm:$0xff] %v572_v51  ;;  %v415_v56 = vadd.f32 %v414_v54, %v1197_v20  ;;  %v390_v57 = vpop.f32.mrf.mxu1 }
  0xa7   :  { %vm528_vm7 = vcmp.gt.f32.partialorder %v402_v53, 0.0  ;;  %v544_v58 = vmul.f32 0.2, %v402_v53 }
  0xa8   :  { %vm529_vm8 = vcmp.gt.f32.partialorder %v415_v56, 0.0  ;;  %v545_v59 = vmul.f32 0.2, %v415_v56 }
  0xa9   :  { %v560_v60 = vsel %vm528_vm7, %v402_v53, %v544_v58 }
  0xaa   :  { %v561_v61 = vsel %vm529_vm8, %v415_v56, %v545_v59 }
  0xab   :  { %v573_v62 = vpack.c.bf16 %v561_v61, %v560_v60 }
  0xac   :  { %v403_v63 = vpop.f32.mrf.mxu2 }
  0xad   :  { %581 = vst [vmem:[%s1242_s3 + $0x18] sm:$0xff] %v573_v62  ;;  %v416_v0 = vpop.f32.mrf.mxu3  ;;  %v427_v1 = vpop.f32.mrf.mxu0 }
  0xae   :  { %v428_v2 = vadd.f32 %v427_v1, %v1197_v20  ;;  %v440_v3 = vpop.f32.mrf.mxu1 }
  0xaf   :  { %v441_v4 = vadd.f32 %v440_v3, %v1197_v20 }
  0xb0   :  { %vm530_vm9 = vcmp.gt.f32.partialorder %v428_v2, 0.0  ;;  %v546_v5 = vmul.f32 0.2, %v428_v2 }
  0xb1   :  { %vm531_vm10 = vcmp.gt.f32.partialorder %v441_v4, 0.0  ;;  %v547_v6 = vmul.f32 0.2, %v441_v4 }
  0xb2   :  { %v562_v7 = vsel %vm530_vm9, %v428_v2, %v546_v5 }
  0xb3   :  { %v563_v8 = vsel %vm531_vm10, %v441_v4, %v547_v6 }
  0xb4   :  { %v574_v9 = vpack.c.bf16 %v563_v8, %v562_v7  ;;  %v453_v10 = vpop.f32.mrf.mxu2 }
  0xb5   :  { %v454_v11 = vadd.f32 %v453_v10, %v1197_v20  ;;  %v466_v12 = vpop.f32.mrf.mxu3  ;;  %v429_v13 = vpop.f32.mrf.mxu0 }
  0xb6   :  { %582 = vst [vmem:[%s1242_s3 + $0x20] sm:$0xff] %v574_v9  ;;  %v467_v14 = vadd.f32 %v466_v12, %v1197_v20  ;;  %v442_v15 = vpop.f32.mrf.mxu1 }
  0xb7   :  { %vm532_vm11 = vcmp.gt.f32.partialorder %v454_v11, 0.0  ;;  %v548_v16 = vmul.f32 0.2, %v454_v11 }
  0xb8   :  { %vm533_vm12 = vcmp.gt.f32.partialorder %v467_v14, 0.0  ;;  %v549_v17 = vmul.f32 0.2, %v467_v14 }
  0xb9   :  { %v564_v18 = vsel %vm532_vm11, %v454_v11, %v548_v16 }
  0xba   :  { %v565_v19 = vsel %vm533_vm12, %v467_v14, %v549_v17 }
  0xbb   :  { %v575_v21 = vpack.c.bf16 %v565_v19, %v564_v18 }
  0xbc   :  { %v455_v22 = vpop.f32.mrf.mxu2 }
  0xbd   :  { %583 = vst [vmem:[%s1242_s3 + $0x28] sm:$0xff] %v575_v21  ;;  %v468_v23 = vpop.f32.mrf.mxu3  ;;  %v479_v24 = vpop.f32.mrf.mxu0 }
  0xbe   :  { %v480_v25 = vadd.f32 %v479_v24, %v1197_v20  ;;  %v492_v26 = vpop.f32.mrf.mxu1 }
  0xbf   :  { %v493_v27 = vadd.f32 %v492_v26, %v1197_v20 }
  0xc0   :  { %vm534_vm13 = vcmp.gt.f32.partialorder %v480_v25, 0.0  ;;  %v550_v28 = vmul.f32 0.2, %v480_v25 }
  0xc1   :  { %vm535_vm14 = vcmp.gt.f32.partialorder %v493_v27, 0.0  ;;  %v551_v29 = vmul.f32 0.2, %v493_v27 }
  0xc2   :  { %v566_v30 = vsel %vm534_vm13, %v480_v25, %v550_v28 }
  0xc3   :  { %v567_v31 = vsel %vm535_vm14, %v493_v27, %v551_v29 }
  0xc4   :  { %v576_v32 = vpack.c.bf16 %v567_v31, %v566_v30  ;;  %v505_v39 = vpop.f32.mrf.mxu2 }
  0xc5   :  { %v506_v33 = vadd.f32 %v505_v39, %v1197_v20  ;;  %v518_v34 = vpop.f32.mrf.mxu3  ;;  %v481_v35 = vpop.f32.mrf.mxu0 }
  0xc6   :  { %584 = vst [vmem:[%s1242_s3 + $0x30] sm:$0xff] %v576_v32  ;;  %v519_v36 = vadd.f32 %v518_v34, %v1197_v20  ;;  %v494_v37 = vpop.f32.mrf.mxu1 }
  0xc7   :  { %vm536_vm15 = vcmp.gt.f32.partialorder %v506_v33, 0.0  ;;  %v552_v38 = vmul.f32 0.2, %v506_v33 }
  0xc8   :  { %vm537_vm0 = vcmp.gt.f32.partialorder %v519_v36, 0.0  ;;  %v553_v40 = vmul.f32 0.2, %v519_v36 }
  0xc9   :  { %v568_v41 = vsel %vm536_vm15, %v506_v33, %v552_v38 }
  0xca   :  { %v569_v42 = vsel %vm537_vm0, %v519_v36, %v553_v40 }
  0xcb   :  { %v577_v43 = vpack.c.bf16 %v569_v42, %v568_v41 }
  0xcc   :  { %v507_v44 = vpop.f32.mrf.mxu2 }
  0xcd   :  { %585 = vst [vmem:[%s1242_s3 + $0x38] sm:$0xff] %v577_v43  ;;  %v520_v45 = vpop.f32.mrf.mxu3 }

// kernel: discriminator_forward.8
= control target key start
LH: loop header
LB: loop body
LE: loop exit
PB: predicated region body
PF: predicated region fallthrough
CT: control target
= control target key end

     0   :  { %s731_s1 = inlined_call_operand.vmem [shape: bf16[128,512], index: 1, kind: input, shape index: {}]   ;;  %s732_s0 = inlined_call_operand.vmem [shape: bf16[16,128], index: 0, kind: input, shape index: {}]   ;;  %s733_s2 = inlined_call_operand.vmem [shape: bf16[16,512], index: 2, kind: output, shape index: {0}]   ;;  %s734_s3 = inlined_call_operand.vmem [shape: f32[16,128], index: 3, kind: output, shape index: {1}]   ;;  %s735_s4 = inlined_call_operand.vmem [shape: f32[16,128], index: 4, kind: output, shape index: {2}]  }
   0x1   :  { %v440_v0 = vld [vmem:[%s731_s1 + $0xe0] sm:$0xf]  ;;  %v485_v1 = vld [vmem:[%s731_s1 + $0xec] sm:$0xf0]  ;;  %v483_v2 = vld [vmem:[%s731_s1 + $0xe4] sm:$0xf] }
   0x2   :  { %v441_v3 = vor.u32 %v485_v1, %v440_v0  ;;  %v442_v4 = vld [vmem:[%s731_s1 + $0xf0] sm:$0xf0]  ;;  %v448_v5 = vld [vmem:[%s731_s1 + $0xe8] sm:$0xf]  ;;  %v486_v6 = vld [vmem:[%s731_s1 + $0xf4] sm:$0xf0] }
   0x3   :  { %v445_v7 = vor.u32 %v483_v2, %v442_v4  ;;  %v449_v8 = vor.u32 %v486_v6, %v448_v5  ;;  %v484_v9 = vld [vmem:[%s731_s1 + $0xec] sm:$0xf]  ;;  %v450_v10 = vld [vmem:[%s731_s1 + $0xf8] sm:$0xf0]  ;;  %v424_v11 = vld [vmem:[%s731_s1 + $0xc0] sm:$0xf] }
   0x4   :  { %214 = vmatpush.bf16.msra.mxu0 %v441_v3  ;;  %v453_v12 = vor.u32 %v484_v9, %v450_v10  ;;  %v481_v13 = vld [vmem:[%s731_s1 + $0xcc] sm:$0xf0]  ;;  %v479_v14 = vld [vmem:[%s731_s1 + $0xc4] sm:$0xf]  ;;  %v426_v15 = vld [vmem:[%s731_s1 + $0xd0] sm:$0xf0] }
   0x5   :  { %228 = vmatpush.bf16.msra.mxu1 %v445_v7  ;;  %242 = vmatpush.bf16.msra.mxu2 %v449_v8  ;;  %v425_v16 = vor.u32 %v481_v13, %v424_v11  ;;  %v429_v17 = vor.u32 %v479_v14, %v426_v15  ;;  %v432_v18 = vld [vmem:[%s731_s1 + $0xc8] sm:$0xf]  ;;  %v482_v19 = vld [vmem:[%s731_s1 + $0xd4] sm:$0xf0]  ;;  %v480_v20 = vld [vmem:[%s731_s1 + $0xcc] sm:$0xf] }
   0x6   :  { %256 = vmatpush.bf16.msra.mxu3 %v453_v12  ;;  %v433_v21 = vor.u32 %v482_v19, %v432_v18  ;;  %v434_v22 = vld [vmem:[%s731_s1 + $0xd8] sm:$0xf0]  ;;  %v408_v23 = vld [vmem:[%s731_s1 + $0xa0] sm:$0xf]  ;;  %v477_v24 = vld [vmem:[%s731_s1 + $0xac] sm:$0xf0] }
   0x7   :  { %v437_v25 = vor.u32 %v480_v20, %v434_v22  ;;  %v475_v26 = vld [vmem:[%s731_s1 + $0xa4] sm:$0xf]  ;;  %v410_v27 = vld [vmem:[%s731_s1 + $0xb0] sm:$0xf0]  ;;  %v416_v28 = vld [vmem:[%s731_s1 + $0xa8] sm:$0xf]  ;;  %v409_v29 = vor.u32 %v477_v24, %v408_v23 }
   0x8   :  { %215 = vmatpush.bf16.msra.mxu0 %v425_v16  ;;  %v478_v30 = vld [vmem:[%s731_s1 + $0xb4] sm:$0xf0]  ;;  %v476_v31 = vld [vmem:[%s731_s1 + $0xac] sm:$0xf]  ;;  %v418_v32 = vld [vmem:[%s731_s1 + $0xb8] sm:$0xf0]  ;;  %v413_v33 = vor.u32 %v475_v26, %v410_v27 }
   0x9   :  { %229 = vmatpush.bf16.msra.mxu1 %v429_v17  ;;  %243 = vmatpush.bf16.msra.mxu2 %v433_v21  ;;  %v417_v34 = vor.u32 %v478_v30, %v416_v28  ;;  %v392_v35 = vld [vmem:[%s731_s1 + $0x80] sm:$0xf]  ;;  %v473_v36 = vld [vmem:[%s731_s1 + $0x8c] sm:$0xf0]  ;;  %v471_v37 = vld [vmem:[%s731_s1 + $0x84] sm:$0xf]  ;;  %v421_v38 = vor.u32 %v476_v31, %v418_v32 }
   0xa   :  { %257 = vmatpush.bf16.msra.mxu3 %v437_v25  ;;  %v394_v39 = vld [vmem:[%s731_s1 + $0x90] sm:$0xf0]  ;;  %v400_v40 = vld [vmem:[%s731_s1 + $0x88] sm:$0xf]  ;;  %v474_v41 = vld [vmem:[%s731_s1 + $0x94] sm:$0xf0]  ;;  %v393_v44 = vor.u32 %v473_v36, %v392_v35 }
   0xb   :  { %v472_v42 = vld [vmem:[%s731_s1 + $0x8c] sm:$0xf]  ;;  %v402_v43 = vld [vmem:[%s731_s1 + $0x98] sm:$0xf0]  ;;  %v397_v45 = vor.u32 %v471_v37, %v394_v39  ;;  %v401_v46 = vor.u32 %v474_v41, %v400_v40  ;;  %v376_v47 = vld [vmem:[%s731_s1 + $0x60] sm:$0xf] }
   0xc   :  { %216 = vmatpush.bf16.msra.mxu0 %v409_v29  ;;  %v469_v48 = vld [vmem:[%s731_s1 + $0x6c] sm:$0xf0]  ;;  %v467_v49 = vld [vmem:[%s731_s1 + $0x64] sm:$0xf]  ;;  %v405_v50 = vor.u32 %v472_v42, %v402_v43  ;;  %v378_v51 = vld [vmem:[%s731_s1 + $0x70] sm:$0xf0] }
   0xd   :  { %230 = vmatpush.bf16.msra.mxu1 %v413_v33  ;;  %244 = vmatpush.bf16.msra.mxu2 %v417_v34  ;;  %v384_v52 = vld [vmem:[%s731_s1 + $0x68] sm:$0xf]  ;;  %v470_v53 = vld [vmem:[%s731_s1 + $0x74] sm:$0xf0]  ;;  %v468_v54 = vld [vmem:[%s731_s1 + $0x6c] sm:$0xf]  ;;  %v377_v56 = vor.u32 %v469_v48, %v376_v47  ;;  %v381_v57 = vor.u32 %v467_v49, %v378_v51 }
   0xe   :  { %258 = vmatpush.bf16.msra.mxu3 %v421_v38  ;;  %v386_v55 = vld [vmem:[%s731_s1 + $0x78] sm:$0xf0]  ;;  %v385_v58 = vor.u32 %v470_v53, %v384_v52  ;;  %v360_v59 = vld [vmem:[%s731_s1 + $0x40] sm:$0xf]  ;;  %v465_v60 = vld [vmem:[%s731_s1 + $0x4c] sm:$0xf0] }
   0xf   :  { %v463_v61 = vld [vmem:[%s731_s1 + $0x44] sm:$0xf]  ;;  %v389_v62 = vor.u32 %v468_v54, %v386_v55  ;;  %v362_v63 = vld [vmem:[%s731_s1 + $0x50] sm:$0xf0]  ;;  %v368_v0 = vld [vmem:[%s731_s1 + $0x48] sm:$0xf]  ;;  %v361_v4 = vor.u32 %v465_v60, %v360_v59 }
  0x10   :  { %217 = vmatpush.bf16.msra.mxu0 %v393_v44  ;;  %v466_v1 = vld [vmem:[%s731_s1 + $0x54] sm:$0xf0]  ;;  %v464_v2 = vld [vmem:[%s731_s1 + $0x4c] sm:$0xf]  ;;  %v370_v3 = vld [vmem:[%s731_s1 + $0x58] sm:$0xf0]  ;;  %v365_v5 = vor.u32 %v463_v61, %v362_v63 }
  0x11   :  { %231 = vmatpush.bf16.msra.mxu1 %v397_v45  ;;  %245 = vmatpush.bf16.msra.mxu2 %v401_v46  ;;  %v369_v6 = vor.u32 %v466_v1, %v368_v0  ;;  %v344_v7 = vld [vmem:[%s731_s1 + $0x20] sm:$0xf]  ;;  %v461_v8 = vld [vmem:[%s731_s1 + $0x2c] sm:$0xf0]  ;;  %v459_v9 = vld [vmem:[%s731_s1 + $0x24] sm:$0xf]  ;;  %v373_v10 = vor.u32 %v464_v2, %v370_v3 }
  0x12   :  { %259 = vmatpush.bf16.msra.mxu3 %v405_v50  ;;  %v346_v11 = vld [vmem:[%s731_s1 + $0x30] sm:$0xf0]  ;;  %v352_v12 = vld [vmem:[%s731_s1 + $0x28] sm:$0xf]  ;;  %v462_v13 = vld [vmem:[%s731_s1 + $0x34] sm:$0xf0]  ;;  %v345_v16 = vor.u32 %v461_v8, %v344_v7 }
  0x13   :  { %v460_v14 = vld [vmem:[%s731_s1 + $0x2c] sm:$0xf]  ;;  %v354_v15 = vld [vmem:[%s731_s1 + $0x38] sm:$0xf0]  ;;  %v349_v17 = vor.u32 %v459_v9, %v346_v11  ;;  %v353_v18 = vor.u32 %v462_v13, %v352_v12  ;;  %v328_v19 = vld [vmem:[%s731_s1] sm:$0xf] }
  0x14   :  { %218 = vmatpush.bf16.msra.mxu0 %v377_v56  ;;  %v457_v20 = vld [vmem:[%s731_s1 + $0xc] sm:$0xf0]  ;;  %v455_v21 = vld [vmem:[%s731_s1 + $0x4] sm:$0xf]  ;;  %v357_v22 = vor.u32 %v460_v14, %v354_v15  ;;  %v330_v23 = vld [vmem:[%s731_s1 + $0x10] sm:$0xf0] }
  0x15   :  { %232 = vmatpush.bf16.msra.mxu1 %v381_v57  ;;  %246 = vmatpush.bf16.msra.mxu2 %v385_v58  ;;  %v336_v24 = vld [vmem:[%s731_s1 + $0x8] sm:$0xf]  ;;  %v458_v25 = vld [vmem:[%s731_s1 + $0x14] sm:$0xf0]  ;;  %v456_v26 = vld [vmem:[%s731_s1 + $0xc] sm:$0xf]  ;;  %v329_v28 = vor.u32 %v457_v20, %v328_v19  ;;  %v333_v29 = vor.u32 %v455_v21, %v330_v23 }
  0x16   :  { %260 = vmatpush.bf16.msra.mxu3 %v389_v62  ;;  %v338_v27 = vld [vmem:[%s731_s1 + $0x18] sm:$0xf0]  ;;  %v337_v30 = vor.u32 %v458_v25, %v336_v24  ;;  %v454_v32 = vld [vmem:[%s732_s0] sm:$0xff] }
  0x17   :  { %v341_v31 = vor.u32 %v456_v26, %v338_v27 }
  0x18   :  { %219 = vmatpush.bf16.msra.mxu0 %v361_v4 }
  0x19   :  { %233 = vmatpush.bf16.msra.mxu1 %v365_v5  ;;  %247 = vmatpush.bf16.msra.mxu2 %v369_v6 }
  0x1a   :  { %261 = vmatpush.bf16.msra.mxu3 %v373_v10 }
  0x1c   :  { %220 = vmatpush.bf16.msra.mxu0 %v345_v16 }
  0x1d   :  { %234 = vmatpush.bf16.msra.mxu1 %v349_v17  ;;  %248 = vmatpush.bf16.msra.mxu2 %v353_v18 }
  0x1e   :  { %262 = vmatpush.bf16.msra.mxu3 %v357_v22 }
  0x20   :  { %221 = vmatpush.bf16.msra.mxu0 %v329_v28 }
  0x21   :  { %235 = vmatpush.bf16.msra.mxu1 %v333_v29  ;;  %249 = vmatpush.bf16.msra.mxu2 %v337_v30 }
  0x22   :  { %263 = vmatpush.bf16.msra.mxu3 %v341_v31 }
  0x23   :  { %222 = vmatmul.bf16.vlgmr.msra.gmra.mxu0 %v454_v32 }
  0x24   :  { %236 = vmatmul.bf16.vlgmr.msra.gmra.mxu1 %v454_v32  ;;  %250 = vmatmul.bf16.vlgmr.msra.gmra.mxu2 %v454_v32 }
  0x25   :  { %264 = vmatmul.bf16.vlgmr.msra.gmra.mxu3 %v454_v32 }
  0xa0   :  { %v223_v33 = vpop.f32.mrf.mxu0 }
  0xa1   :  { %v237_v34 = vpop.f32.mrf.mxu1  ;;  %v288_v36 = vmul.f32 %v223_v33, %v223_v33 }
  0xa2   :  { %v270_v35 = vpack.c.bf16 %v237_v34, %v223_v33  ;;  %v289_v37 = vmul.f32 %v237_v34, %v237_v34  ;;  %v278_v38 = vadd.f32 %v237_v34, %v223_v33 }
  0xa4   :  { %274 = vst [vmem:[%s733_s2] sm:$0xff] %v270_v35  ;;  %v296_v40 = vadd.f32 %v289_v37, %v288_v36 }
  0xa7   :  { %v251_v39 = vpop.f32.mrf.mxu2 }
  0xa8   :  { %v290_v41 = vmul.f32 %v251_v39, %v251_v39  ;;  %v265_v42 = vpop.f32.mrf.mxu3  ;;  %v225_v43 = vpop.f32.mrf.mxu0  ;;  %v279_v44 = vadd.f32 %v278_v38, %v251_v39 }
  0xa9   :  { %v271_v45 = vpack.c.bf16 %v265_v42, %v251_v39  ;;  %v239_v46 = vpop.f32.mrf.mxu1  ;;  %v291_v47 = vmul.f32 %v265_v42, %v265_v42  ;;  %v292_v51 = vmul.f32 %v225_v43, %v225_v43 }
  0xaa   :  { %v272_v48 = vpack.c.bf16 %v239_v46, %v225_v43  ;;  %v280_v49 = vadd.f32 %v279_v44, %v265_v42  ;;  %v297_v50 = vadd.f32 %v296_v40, %v290_v41  ;;  %v293_v52 = vmul.f32 %v239_v46, %v239_v46 }
  0xab   :  { %275 = vst [vmem:[%s733_s2 + $0x8] sm:$0xff] %v271_v45  ;;  %v283_v54 = vadd.f32 %v239_v46, %v225_v43 }
  0xac   :  { %276 = vst [vmem:[%s733_s2 + $0x10] sm:$0xff] %v272_v48  ;;  %281 = vadd.xlane.f32.xlu0 %v280_v49  ;;  %v298_v53 = vadd.f32 %v297_v50, %v291_v47  ;;  %v301_v56 = vadd.f32 %v293_v52, %v292_v51 }
  0xae   :  { %299 = vadd.xlane.f32.xlu1 %v298_v53 }
  0xaf   :  { %v253_v55 = vpop.f32.mrf.mxu2 }
  0xb0   :  { %v284_v57 = vadd.f32 %v283_v54, %v253_v55  ;;  %v294_v58 = vmul.f32 %v253_v55, %v253_v55  ;;  %v267_v59 = vpop.f32.mrf.mxu3 }
  0xb1   :  { %v273_v60 = vpack.c.bf16 %v267_v59, %v253_v55  ;;  %v295_v61 = vmul.f32 %v267_v59, %v267_v59 }
  0xb2   :  { %v285_v62 = vadd.f32 %v284_v57, %v267_v59  ;;  %v302_v63 = vadd.f32 %v301_v56, %v294_v58 }
  0xb3   :  { %277 = vst [vmem:[%s733_s2 + $0x18] sm:$0xff] %v273_v60 }
  0xb4   :  { %286 = vadd.xlane.f32.xlu0 %v285_v62  ;;  %v303_v0 = vadd.f32 %v302_v63, %v295_v61 }
  0xb6   :  { %304 = vadd.xlane.f32.xlu1 %v303_v0 }
 0x11f   :  { %v282_v1 = vpop.xlane.xlu0 %281 }
 0x120   :  { %306 = vst [vmem:[%s734_s3] sm:$0xff] %v282_v1 }
 0x121   :  { %v300_v2 = vpop.xlane.xlu1 %299 }
 0x122   :  { %308 = vst [vmem:[%s735_s4] sm:$0xff] %v300_v2 }
 0x127   :  { %v287_v3 = vpop.xlane.xlu0 %286 }
 0x128   :  { %307 = vst [vmem:[%s734_s3 + $0x8] sm:$0xff] %v287_v3 }
 0x129   :  { %v305_v4 = vpop.xlane.xlu1 %304 }
 0x12a   :  { %309 = vst [vmem:[%s735_s4 + $0x8] sm:$0xff] %v305_v4 }

// kernel: discriminator_forward.9
= control target key start
LH: loop header
LB: loop body
LE: loop exit
PB: predicated region body
PF: predicated region fallthrough
CT: control target
= control target key end

     0   :  { %v105_v0 = vmov 0   ;;  %s162_s2 = inlined_call_operand.vmem [shape: f32[16,1], index: 2, kind: input, shape index: {}]   ;;  %s163_s1 = inlined_call_operand.vmem [shape: f32[16,1], index: 1, kind: input, shape index: {}]   ;;  %s164_s0 = inlined_call_operand.vmem [shape: bf16[16,512], index: 0, kind: input, shape index: {}]   ;;  %s165_s3 = inlined_call_operand.vmem [shape: bf16[16,512], index: 3, kind: output, shape index: {}]  }
   0x1   :  { %104 = vset.pattern.permute.xlu1 %v105_v0  ;;  %103 = vset.pattern.permute.xlu0 %v105_v0  ;;  %v46_v1 = vld [vmem:[%s162_s2] sm:$0xff]  ;;  %v47_v3 = vld [vmem:[%s162_s2 + $0x8] sm:$0xff]  ;;  %v16_v17 = vld [vmem:[%s164_s0 + $0x10] sm:$0xff] }
   0x2   :  { %v26_v2 = vld [vmem:[%s163_s1] sm:$0xff]  ;;  %50 = vperm.xlu1 %104, %v46_v1   ;;  %v27_v4 = vld [vmem:[%s163_s1 + $0x8] sm:$0xff]  ;;  %v17_v18 = vld [vmem:[%s164_s0 + $0x18] sm:$0xff]  ;;  %v22_v23 = vunpack.c.l.bf16 %v16_v17  ;;  %v23_v24 = vunpack.c.h.bf16 %v16_v17 }
   0x3   :  { %30 = vperm.xlu0 %103, %v26_v2   ;;  %v14_v5 = vld [vmem:[%s164_s0] sm:$0xff]  ;;  %v15_v6 = vld [vmem:[%s164_s0 + $0x8] sm:$0xff]  ;;  %v24_v25 = vunpack.c.l.bf16 %v17_v18  ;;  %v25_v29 = vunpack.c.h.bf16 %v17_v18 }
   0x4   :  { %v18_v7 = vunpack.c.l.bf16 %v14_v5  ;;  %v19_v8 = vunpack.c.h.bf16 %v14_v5  ;;  %v20_v9 = vunpack.c.l.bf16 %v15_v6  ;;  %v21_v10 = vunpack.c.h.bf16 %v15_v6 }
   0xa   :  { %55 = vperm.xlu1 %104, %v47_v3  }
   0xb   :  { %35 = vperm.xlu0 %103, %v27_v4  }
  0x74   :  { %v51_v11 = vpop.permute.xlu1 %50 }
  0x75   :  { %v31_v12 = vpop.permute.xlu0 %30 }
  0x76   :  { %v38_v13 = vmul.f32 %v31_v12, %v18_v7  ;;  %v39_v14 = vmul.f32 %v31_v12, %v19_v8  ;;  %v40_v15 = vmul.f32 %v31_v12, %v20_v9  ;;  %v41_v16 = vmul.f32 %v31_v12, %v21_v10 }
  0x78   :  { %v58_v19 = vadd.f32 %v51_v11, %v38_v13  ;;  %v59_v20 = vadd.f32 %v51_v11, %v39_v14  ;;  %v60_v21 = vadd.f32 %v51_v11, %v40_v15  ;;  %v61_v22 = vadd.f32 %v51_v11, %v41_v16 }
  0x7a   :  { %vm66_vm0 = vcmp.gt.f32.partialorder %v58_v19, 0.0  ;;  %vm67_vm1 = vcmp.gt.f32.partialorder %v59_v20, 0.0  ;;  %vm68_vm2 = vcmp.gt.f32.partialorder %v60_v21, 0.0  ;;  %vm69_vm3 = vcmp.gt.f32.partialorder %v61_v22, 0.0 }
  0x7b   :  { %v74_v26 = vmul.f32 0.2, %v58_v19  ;;  %v75_v27 = vmul.f32 0.2, %v59_v20  ;;  %v76_v28 = vmul.f32 0.2, %v60_v21 }
  0x7c   :  { %v77_v30 = vmul.f32 0.2, %v61_v22  ;;  %v56_v40 = vpop.permute.xlu1 %55 }
  0x7d   :  { %v82_v31 = vsel %vm66_vm0, %v58_v19, %v74_v26  ;;  %v83_v32 = vsel %vm67_vm1, %v59_v20, %v75_v27  ;;  %v84_v33 = vsel %vm68_vm2, %v60_v21, %v76_v28  ;;  %v36_v34 = vpop.permute.xlu0 %35 }
  0x7e   :  { %v85_v35 = vsel %vm69_vm3, %v61_v22, %v77_v30  ;;  %v90_v36 = vpack.c.bf16 %v83_v32, %v82_v31  ;;  %v42_v37 = vmul.f32 %v36_v34, %v22_v23  ;;  %v43_v38 = vmul.f32 %v36_v34, %v23_v24 }
  0x7f   :  { %v91_v39 = vpack.c.bf16 %v85_v35, %v84_v33  ;;  %v44_v41 = vmul.f32 %v36_v34, %v24_v25  ;;  %v45_v42 = vmul.f32 %v36_v34, %v25_v29 }
  0x80   :  { %94 = vst [vmem:[%s165_s3] sm:$0xff] %v90_v36  ;;  %v62_v43 = vadd.f32 %v56_v40, %v42_v37  ;;  %v63_v44 = vadd.f32 %v56_v40, %v43_v38 }
  0x81   :  { %95 = vst [vmem:[%s165_s3 + $0x8] sm:$0xff] %v91_v39  ;;  %v64_v45 = vadd.f32 %v56_v40, %v44_v41  ;;  %v65_v46 = vadd.f32 %v56_v40, %v45_v42 }
  0x82   :  { %vm70_vm4 = vcmp.gt.f32.partialorder %v62_v43, 0.0  ;;  %vm71_vm5 = vcmp.gt.f32.partialorder %v63_v44, 0.0  ;;  %v78_v47 = vmul.f32 0.2, %v62_v43  ;;  %v79_v48 = vmul.f32 0.2, %v63_v44 }
  0x83   :  { %vm72_vm6 = vcmp.gt.f32.partialorder %v64_v45, 0.0  ;;  %vm73_vm7 = vcmp.gt.f32.partialorder %v65_v46, 0.0  ;;  %v80_v49 = vmul.f32 0.2, %v64_v45  ;;  %v81_v50 = vmul.f32 0.2, %v65_v46 }
  0x84   :  { %v86_v51 = vsel %vm70_vm4, %v62_v43, %v78_v47  ;;  %v87_v52 = vsel %vm71_vm5, %v63_v44, %v79_v48 }
  0x85   :  { %v88_v53 = vsel %vm72_vm6, %v64_v45, %v80_v49  ;;  %v89_v54 = vsel %vm73_vm7, %v65_v46, %v81_v50  ;;  %v92_v55 = vpack.c.bf16 %v87_v52, %v86_v51 }
  0x86   :  { %v93_v56 = vpack.c.bf16 %v89_v54, %v88_v53 }
  0x87   :  { %96 = vst [vmem:[%s165_s3 + $0x10] sm:$0xff] %v92_v55 }
  0x88   :  { %97 = vst [vmem:[%s165_s3 + $0x18] sm:$0xff] %v93_v56 }

// kernel: discriminator_forward.10
= control target key start
LH: loop header
LB: loop body
LE: loop exit
PB: predicated region body
PF: predicated region fallthrough
CT: control target
= control target key end

     0   :  { %s506_s1 = inlined_call_operand.vmem [shape: bf16[256,128], index: 1, kind: input, shape index: {}]   ;;  %s507_s0 = inlined_call_operand.vmem [shape: bf16[32,256], index: 0, kind: input, shape index: {}]   ;;  %s508_s2 = inlined_call_operand.vmem [shape: bf16[32,128], index: 2, kind: output, shape index: {0}]   ;;  %s509_s3 = inlined_call_operand.vmem [shape: f32[32,128], index: 3, kind: output, shape index: {1}]   ;;  %s510_s4 = inlined_call_operand.vmem [shape: f32[32,128], index: 4, kind: output, shape index: {2}]  }
   0x1   :  { %v343_v0 = vld [vmem:[%s506_s1 + $0x38] sm:$0xff]  ;;  %v342_v2 = vld [vmem:[%s506_s1 + $0x30] sm:$0xff]  ;;  %v341_v4 = vld [vmem:[%s506_s1 + $0x28] sm:$0xff] }
   0x2   :  { %v351_v1 = vld [vmem:[%s506_s1 + $0x78] sm:$0xff]  ;;  %166 = vmatpush.bf16.msra.mxu0 %v343_v0  ;;  %363 = vmatpush.bf16.msra.mxu2 %v343_v0  ;;  %v350_v3 = vld [vmem:[%s506_s1 + $0x70] sm:$0xff]  ;;  %v349_v5 = vld [vmem:[%s506_s1 + $0x68] sm:$0xff] }
   0x3   :  { %185 = vmatpush.bf16.msra.mxu1 %v351_v1  ;;  %371 = vmatpush.bf16.msra.mxu3 %v351_v1  ;;  %v340_v6 = vld [vmem:[%s506_s1 + $0x20] sm:$0xff]  ;;  %v339_v8 = vld [vmem:[%s506_s1 + $0x18] sm:$0xff]  ;;  %v338_v10 = vld [vmem:[%s506_s1 + $0x10] sm:$0xff] }
   0x4   :  { %v348_v7 = vld [vmem:[%s506_s1 + $0x60] sm:$0xff]  ;;  %v347_v9 = vld [vmem:[%s506_s1 + $0x58] sm:$0xff]  ;;  %v346_v11 = vld [vmem:[%s506_s1 + $0x50] sm:$0xff] }
   0x5   :  { %v337_v12 = vld [vmem:[%s506_s1 + $0x8] sm:$0xff]  ;;  %v336_v14 = vld [vmem:[%s506_s1] sm:$0xff]  ;;  %v262_v18 = vld [vmem:[%s507_s0 + $0x10] sm:$0xf] }
   0x6   :  { %167 = vmatpush.bf16.msra.mxu0 %v342_v2  ;;  %364 = vmatpush.bf16.msra.mxu2 %v342_v2  ;;  %v345_v13 = vld [vmem:[%s506_s1 + $0x48] sm:$0xff]  ;;  %v344_v15 = vld [vmem:[%s506_s1 + $0x40] sm:$0xff]  ;;  %v335_v19 = vld [vmem:[%s507_s0 + $0x14] sm:$0xf0] }
   0x7   :  { %186 = vmatpush.bf16.msra.mxu1 %v350_v3  ;;  %372 = vmatpush.bf16.msra.mxu3 %v350_v3  ;;  %v254_v16 = vld [vmem:[%s507_s0] sm:$0xf]  ;;  %v333_v17 = vld [vmem:[%s507_s0 + $0x4] sm:$0xf0]  ;;  %v332_v20 = vld [vmem:[%s507_s0 + $0x4] sm:$0xf]  ;;  %v263_v25 = vor.u32 %v335_v19, %v262_v18 }
   0x8   :  { %v256_v21 = vld [vmem:[%s507_s0 + $0x8] sm:$0xf0]  ;;  %v334_v22 = vld [vmem:[%s507_s0 + $0x14] sm:$0xf]  ;;  %v264_v23 = vld [vmem:[%s507_s0 + $0x18] sm:$0xf0]  ;;  %v255_v24 = vor.u32 %v333_v17, %v254_v16 }
   0x9   :  { %v259_v26 = vor.u32 %v332_v20, %v256_v21  ;;  %v267_v27 = vor.u32 %v334_v22, %v264_v23 }
   0xa   :  { %168 = vmatpush.bf16.msra.mxu0 %v341_v4  ;;  %365 = vmatpush.bf16.msra.mxu2 %v341_v4 }
   0xb   :  { %187 = vmatpush.bf16.msra.mxu1 %v349_v5  ;;  %373 = vmatpush.bf16.msra.mxu3 %v349_v5 }
   0xe   :  { %169 = vmatpush.bf16.msra.mxu0 %v340_v6  ;;  %366 = vmatpush.bf16.msra.mxu2 %v340_v6 }
   0xf   :  { %188 = vmatpush.bf16.msra.mxu1 %v348_v7  ;;  %374 = vmatpush.bf16.msra.mxu3 %v348_v7 }
  0x12   :  { %170 = vmatpush.bf16.msra.mxu0 %v339_v8  ;;  %367 = vmatpush.bf16.msra.mxu2 %v339_v8 }
  0x13   :  { %189 = vmatpush.bf16.msra.mxu1 %v347_v9  ;;  %375 = vmatpush.bf16.msra.mxu3 %v347_v9 }
  0x16   :  { %171 = vmatpush.bf16.msra.mxu0 %v338_v10  ;;  %368 = vmatpush.bf16.msra.mxu2 %v338_v10 }
  0x17   :  { %190 = vmatpush.bf16.msra.mxu1 %v346_v11  ;;  %376 = vmatpush.bf16.msra.mxu3 %v346_v11 }
  0x1a   :  { %172 = vmatpush.bf16.msra.mxu0 %v337_v12  ;;  %369 = vmatpush.bf16.msra.mxu2 %v337_v12 }
  0x1b   :  { %191 = vmatpush.bf16.msra.mxu1 %v345_v13  ;;  %377 = vmatpush.bf16.msra.mxu3 %v345_v13 }
  0x1e   :  { %173 = vmatpush.bf16.msra.mxu0 %v336_v14  ;;  %370 = vmatpush.bf16.msra.mxu2 %v336_v14 }
  0x1f   :  { %192 = vmatpush.bf16.msra.mxu1 %v344_v15  ;;  %378 = vmatpush.bf16.msra.mxu3 %v344_v15 }
  0x21   :  { %174 = vmatmul.bf16.vlgmr.msra.gmra.mxu0 %v255_v24  ;;  %179 = vmatmul.bf16.vlgmr.msra.gmra.mxu2 %v263_v25 }
  0x22   :  { %193 = vmatmul.bf16.vlgmr.msra.gmra.mxu1 %v259_v26  ;;  %198 = vmatmul.bf16.vlgmr.msra.gmra.mxu3 %v267_v27 }
  0x9e   :  { %v175_v28 = vpop.f32.mrf.mxu0 }
  0x9f   :  { %v194_v29 = vpop.f32.mrf.mxu1 }
  0xa0   :  { %v195_v30 = vadd.f32 %v194_v29, %v175_v28 }
  0xa2   :  { %212 = vadd.xlane.f32.xlu0 %v195_v30  ;;  %v220_v31 = vmul.f32 %v195_v30, %v195_v30 }
  0xa4   :  { %224 = vadd.xlane.f32.xlu2 %v220_v31  ;;  %v180_v32 = vpop.f32.mrf.mxu2 }
  0xa5   :  { %v199_v33 = vpop.f32.mrf.mxu3 }
  0xa6   :  { %v200_v34 = vadd.f32 %v199_v33, %v180_v32  ;;  %v177_v35 = vpop.f32.mrf.mxu0 }
  0xa7   :  { %v196_v36 = vpop.f32.mrf.mxu1 }
  0xa8   :  { %v197_v37 = vadd.f32 %v196_v36, %v177_v35  ;;  %216 = vadd.xlane.f32.xlu1 %v200_v34  ;;  %v222_v44 = vmul.f32 %v200_v34, %v200_v34 }
  0xaa   :  { %v355_v38 = vpack.c.bf16 %v197_v37, %v195_v30  ;;  %214 = vadd.xlane.f32.xlu0 %v197_v37  ;;  %v221_v39 = vmul.f32 %v197_v37, %v197_v37 }
  0xac   :  { %356 = vst [vmem:[%s508_s2] sm:$0xff] %v355_v38   ;;  %226 = vadd.xlane.f32.xlu2 %v221_v39  ;;  %v182_v40 = vpop.f32.mrf.mxu2 }
  0xad   :  { %v201_v41 = vpop.f32.mrf.mxu3 }
  0xae   :  { %v202_v42 = vadd.f32 %v201_v41, %v182_v40 }
  0xb0   :  { %v360_v43 = vpack.c.bf16 %v202_v42, %v200_v34  ;;  %218 = vadd.xlane.f32.xlu1 %v202_v42  ;;  %v223_v45 = vmul.f32 %v202_v42, %v202_v42 }
  0xb2   :  { %362 = vst [vmem:[%s508_s2 + $0x8] sm:$0xff] %v360_v43   ;;  %228 = vadd.xlane.f32.xlu0 %v222_v44 }
  0xb8   :  { %230 = vadd.xlane.f32.xlu1 %v223_v45 }
 0x115   :  { %v213_v46 = vpop.xlane.xlu0 %212 }
 0x116   :  { %232 = vst [vmem:[%s509_s3] sm:$0xff] %v213_v46 }
 0x117   :  { %v225_v47 = vpop.xlane.xlu2 %224 }
 0x118   :  { %236 = vst [vmem:[%s510_s4] sm:$0xff] %v225_v47 }
 0x11b   :  { %v217_v48 = vpop.xlane.xlu1 %216 }
 0x11c   :  { %234 = vst [vmem:[%s509_s3 + $0x10] sm:$0xff] %v217_v48 }
 0x11d   :  { %v215_v49 = vpop.xlane.xlu0 %214 }
 0x11e   :  { %233 = vst [vmem:[%s509_s3 + $0x8] sm:$0xff] %v215_v49 }
 0x11f   :  { %v227_v50 = vpop.xlane.xlu2 %226 }
 0x120   :  { %237 = vst [vmem:[%s510_s4 + $0x8] sm:$0xff] %v227_v50 }
 0x123   :  { %v219_v51 = vpop.xlane.xlu1 %218 }
 0x124   :  { %235 = vst [vmem:[%s509_s3 + $0x18] sm:$0xff] %v219_v51 }
 0x125   :  { %v229_v52 = vpop.xlane.xlu0 %228 }
 0x126   :  { %238 = vst [vmem:[%s510_s4 + $0x10] sm:$0xff] %v229_v52 }
 0x12b   :  { %v231_v53 = vpop.xlane.xlu1 %230 }
 0x12c   :  { %239 = vst [vmem:[%s510_s4 + $0x18] sm:$0xff] %v231_v53 }

// kernel: discriminator_forward.11
= control target key start
LH: loop header
LB: loop body
LE: loop exit
PB: predicated region body
PF: predicated region fallthrough
CT: control target
= control target key end

     0   :  { %v126_v0 = vmov 0   ;;  %s183_s1 = inlined_call_operand.vmem [shape: f32[32,1], index: 1, kind: input, shape index: {}]   ;;  %s184_s2 = inlined_call_operand.vmem [shape: f32[32,1], index: 2, kind: input, shape index: {}]   ;;  %s185_s0 = inlined_call_operand.vmem [shape: bf16[32,128], index: 0, kind: input, shape index: {}]   ;;  %s186_s3 = inlined_call_operand.vmem [shape: bf16[32,128], index: 3, kind: output, shape index: {}]  }
   0x1   :  { %124 = vset.pattern.permute.xlu1 %v126_v0  ;;  %123 = vset.pattern.permute.xlu0 %v126_v0  ;;  %v24_v1 = vld [vmem:[%s183_s1 + $0x10] sm:$0xff]  ;;  %v22_v2 = vld [vmem:[%s183_s1] sm:$0xff]  ;;  %v25_v4 = vld [vmem:[%s183_s1 + $0x18] sm:$0xff] }
   0x2   :  { %38 = vperm.xlu1 %124, %v24_v1   ;;  %28 = vperm.xlu0 %123, %v22_v2   ;;  %v50_v3 = vld [vmem:[%s184_s2] sm:$0xff]  ;;  %v23_v5 = vld [vmem:[%s183_s1 + $0x8] sm:$0xff]  ;;  %v53_v7 = vld [vmem:[%s184_s2 + $0x18] sm:$0xff] }
   0x3   :  { %125 = vset.pattern.permute.xlu2 %v126_v0  ;;  %v51_v6 = vld [vmem:[%s184_s2 + $0x8] sm:$0xff]  ;;  %v52_v8 = vld [vmem:[%s184_s2 + $0x10] sm:$0xff]  ;;  %v103_v9 = vld [vmem:[%s185_s0] sm:$0xff]  }
   0x4   :  { %56 = vperm.xlu2 %125, %v50_v3   ;;  %v104_v11 = vunpack.c.l.bf16 %v103_v9  ;;  %v105_v15 = vunpack.c.h.bf16 %v103_v9  ;;  %v120_v17 = vld [vmem:[%s185_s0 + $0x8] sm:$0xff]  }
   0x5   :  { %v108_v22 = vunpack.c.l.bf16 %v120_v17  ;;  %v109_v24 = vunpack.c.h.bf16 %v120_v17 }
   0xa   :  { %43 = vperm.xlu1 %124, %v25_v4   ;;  %33 = vperm.xlu0 %123, %v23_v5  }
   0xc   :  { %61 = vperm.xlu2 %125, %v51_v6  }
  0x12   :  { %71 = vperm.xlu1 %124, %v53_v7   ;;  %66 = vperm.xlu0 %123, %v52_v8  }
  0x5e   :  { %v57_v10 = vpop.permute.xlu2 %56 }
  0x66   :  { %v62_v21 = vpop.permute.xlu2 %61 }
  0x74   :  { %v39_v12 = vpop.permute.xlu1 %38  ;;  %v29_v13 = vpop.permute.xlu0 %28 }
  0x75   :  { %v46_v14 = vmul.f32 %v104_v11, %v29_v13  ;;  %v48_v27 = vmul.f32 %v108_v22, %v39_v12 }
  0x77   :  { %v74_v16 = vadd.f32 %v57_v10, %v46_v14 }
  0x79   :  { %v82_v23 = vmul.f32 0.2, %v74_v16  ;;  %vm78_vm0 = vcmp.gt.f32.partialorder %v74_v16, 0.0 }
  0x7b   :  { %v86_v28 = vsel %vm78_vm0, %v74_v16, %v82_v23 }
  0x7c   :  { %v44_v18 = vpop.permute.xlu1 %43  ;;  %v34_v19 = vpop.permute.xlu0 %33 }
  0x7d   :  { %v47_v20 = vmul.f32 %v105_v15, %v34_v19  ;;  %v49_v29 = vmul.f32 %v109_v24, %v44_v18 }
  0x7f   :  { %v75_v25 = vadd.f32 %v62_v21, %v47_v20 }
  0x81   :  { %vm79_vm1 = vcmp.gt.f32.partialorder %v75_v25, 0.0  ;;  %v83_v26 = vmul.f32 0.2, %v75_v25 }
  0x83   :  { %v87_v30 = vsel %vm79_vm1, %v75_v25, %v83_v26 }
  0x84   :  { %v113_v31 = vpack.c.bf16 %v87_v30, %v86_v28  ;;  %v72_v32 = vpop.permute.xlu1 %71  ;;  %v67_v33 = vpop.permute.xlu0 %66 }
  0x85   :  { %v77_v34 = vadd.f32 %v72_v32, %v49_v29  ;;  %v76_v35 = vadd.f32 %v67_v33, %v48_v27 }
  0x86   :  { %114 = vst [vmem:[%s186_s3] sm:$0xff] %v113_v31  }
  0x87   :  { %vm81_vm2 = vcmp.gt.f32.partialorder %v77_v34, 0.0  ;;  %v85_v36 = vmul.f32 0.2, %v77_v34  ;;  %vm80_vm3 = vcmp.gt.f32.partialorder %v76_v35, 0.0  ;;  %v84_v37 = vmul.f32 0.2, %v76_v35 }
  0x89   :  { %v89_v38 = vsel %vm81_vm2, %v77_v34, %v85_v36  ;;  %v88_v39 = vsel %vm80_vm3, %v76_v35, %v84_v37 }
  0x8a   :  { %v118_v40 = vpack.c.bf16 %v89_v38, %v88_v39 }
  0x8c   :  { %121 = vst [vmem:[%s186_s3 + $0x8] sm:$0xff] %v118_v40  }

// kernel: discriminator_forward.13
= control target key start
LH: loop header
LB: loop body
LE: loop exit
PB: predicated region body
PF: predicated region fallthrough
CT: control target
= control target key end

     0   :  { %v232_v0 = vmov 0   ;;  %s325_s1 = inlined_call_operand.vmem [shape: f32[64,1], index: 1, kind: input, shape index: {}]   ;;  %s326_s2 = inlined_call_operand.vmem [shape: f32[64,1], index: 2, kind: input, shape index: {}]   ;;  %s327_s0 = inlined_call_operand.vmem [shape: bf16[64,128], index: 0, kind: input, shape index: {}]   ;;  %s328_s3 = inlined_call_operand.vmem [shape: bf16[64,128], index: 3, kind: output, shape index: {}]  }
   0x1   :  { %231 = vset.pattern.permute.xlu2 %v232_v0  ;;  %230 = vset.pattern.permute.xlu1 %v232_v0  ;;  %v34_v1 = vld [vmem:[%s325_s1 + $0x20] sm:$0xff]  ;;  %v32_v2 = vld [vmem:[%s325_s1 + $0x10] sm:$0xff]  ;;  %v35_v4 = vld [vmem:[%s325_s1 + $0x28] sm:$0xff] }
   0x2   :  { %v30_v3 = vld [vmem:[%s325_s1] sm:$0xff]  ;;  %229 = vset.pattern.permute.xlu0 %v232_v0  ;;  %60 = vperm.xlu2 %231, %v34_v1   ;;  %v33_v5 = vld [vmem:[%s325_s1 + $0x18] sm:$0xff]  ;;  %v31_v6 = vld [vmem:[%s325_s1 + $0x8] sm:$0xff] }
   0x3   :  { %50 = vperm.xlu1 %230, %v32_v2   ;;  %40 = vperm.xlu0 %229, %v30_v3   ;;  %v86_v7 = vld [vmem:[%s326_s2] sm:$0xff]  ;;  %v37_v8 = vld [vmem:[%s325_s1 + $0x38] sm:$0xff]  ;;  %v36_v9 = vld [vmem:[%s325_s1 + $0x30] sm:$0xff] }
   0x4   :  { %v89_v10 = vld [vmem:[%s326_s2 + $0x18] sm:$0xff]  ;;  %v88_v11 = vld [vmem:[%s326_s2 + $0x10] sm:$0xff]  ;;  %v87_v12 = vld [vmem:[%s326_s2 + $0x8] sm:$0xff] }
   0x5   :  { %v92_v13 = vld [vmem:[%s326_s2 + $0x30] sm:$0xff]  ;;  %v91_v14 = vld [vmem:[%s326_s2 + $0x28] sm:$0xff]  ;;  %v90_v15 = vld [vmem:[%s326_s2 + $0x20] sm:$0xff] }
   0x6   :  { %v93_v16 = vld [vmem:[%s326_s2 + $0x38] sm:$0xff]  ;;  %v222_v24 = vld [vmem:[%s327_s0 + $0x8] sm:$0xff]   ;;  %v187_v25 = vld [vmem:[%s327_s0] sm:$0xff]  }
   0x7   :  { %v188_v26 = vunpack.c.l.bf16 %v187_v25  ;;  %v193_v27 = vunpack.c.h.bf16 %v222_v24  ;;  %v192_v32 = vunpack.c.l.bf16 %v222_v24  ;;  %v189_v33 = vunpack.c.h.bf16 %v187_v25  ;;  %v223_v37 = vld [vmem:[%s327_s0 + $0x10] sm:$0xff]   ;;  %v224_v44 = vld [vmem:[%s327_s0 + $0x18] sm:$0xff]  }
   0x8   :  { %v196_v47 = vunpack.c.l.bf16 %v223_v37  ;;  %v197_v48 = vunpack.c.h.bf16 %v223_v37  ;;  %v200_v51 = vunpack.c.l.bf16 %v224_v44  ;;  %v201_v1 = vunpack.c.h.bf16 %v224_v44 }
   0xa   :  { %65 = vperm.xlu2 %231, %v35_v4  }
   0xb   :  { %55 = vperm.xlu1 %230, %v33_v5   ;;  %45 = vperm.xlu0 %229, %v31_v6  }
  0x12   :  { %96 = vperm.xlu2 %231, %v86_v7  }
  0x13   :  { %75 = vperm.xlu1 %230, %v37_v8   ;;  %70 = vperm.xlu0 %229, %v36_v9  }
  0x1a   :  { %111 = vperm.xlu2 %231, %v89_v10  }
  0x1b   :  { %106 = vperm.xlu1 %230, %v88_v11   ;;  %101 = vperm.xlu0 %229, %v87_v12  }
  0x22   :  { %126 = vperm.xlu2 %231, %v92_v13  }
  0x23   :  { %121 = vperm.xlu1 %230, %v91_v14   ;;  %116 = vperm.xlu0 %229, %v90_v15  }
  0x2b   :  { %131 = vperm.xlu0 %229, %v93_v16  }
  0x5c   :  { %v61_v17 = vpop.permute.xlu2 %60 }
  0x5d   :  { %v82_v58 = vmul.f32 %v196_v47, %v61_v17 }
  0x64   :  { %v66_v18 = vpop.permute.xlu2 %65 }
  0x65   :  { %v83_v59 = vmul.f32 %v197_v48, %v66_v18 }
  0x6c   :  { %v97_v23 = vpop.permute.xlu2 %96 }
  0x74   :  { %v112_v34 = vpop.permute.xlu2 %111 }
  0x75   :  { %v51_v19 = vpop.permute.xlu1 %50  ;;  %v41_v20 = vpop.permute.xlu0 %40 }
  0x76   :  { %v78_v30 = vmul.f32 %v188_v26, %v41_v20  ;;  %v80_v38 = vmul.f32 %v192_v32, %v51_v19 }
  0x78   :  { %v134_v35 = vadd.f32 %v97_v23, %v78_v30 }
  0x7a   :  { %v150_v42 = vmul.f32 0.2, %v134_v35  ;;  %vm142_vm0 = vcmp.gt.f32.partialorder %v134_v35, 0.0 }
  0x7c   :  { %v158_v54 = vsel %vm142_vm0, %v134_v35, %v150_v42  ;;  %v127_v4 = vpop.permute.xlu2 %126 }
  0x7d   :  { %v56_v21 = vpop.permute.xlu1 %55  ;;  %v46_v22 = vpop.permute.xlu0 %45 }
  0x7e   :  { %v81_v31 = vmul.f32 %v193_v27, %v56_v21  ;;  %v79_v39 = vmul.f32 %v189_v33, %v46_v22 }
  0x80   :  { %v137_v36 = vadd.f32 %v112_v34, %v81_v31 }
  0x82   :  { %v153_v43 = vmul.f32 0.2, %v137_v36  ;;  %vm145_vm1 = vcmp.gt.f32.partialorder %v137_v36, 0.0 }
  0x84   :  { %v161_v53 = vsel %vm145_vm1, %v137_v36, %v153_v43 }
  0x85   :  { %v76_v28 = vpop.permute.xlu1 %75  ;;  %v71_v29 = vpop.permute.xlu0 %70 }
  0x86   :  { %v84_v62 = vmul.f32 %v200_v51, %v71_v29  ;;  %v85_v9 = vmul.f32 %v201_v1, %v76_v28 }
  0x88   :  { %v140_v5 = vadd.f32 %v127_v4, %v84_v62 }
  0x8a   :  { %v156_v11 = vmul.f32 0.2, %v140_v5  ;;  %vm148_vm6 = vcmp.gt.f32.partialorder %v140_v5, 0.0 }
  0x8c   :  { %v164_v14 = vsel %vm148_vm6, %v140_v5, %v156_v11 }
  0x8d   :  { %v107_v40 = vpop.permute.xlu1 %106  ;;  %v102_v41 = vpop.permute.xlu0 %101 }
  0x8e   :  { %v136_v45 = vadd.f32 %v107_v40, %v80_v38  ;;  %v135_v46 = vadd.f32 %v102_v41, %v79_v39 }
  0x90   :  { %vm144_vm2 = vcmp.gt.f32.partialorder %v136_v45, 0.0  ;;  %v152_v49 = vmul.f32 0.2, %v136_v45  ;;  %vm143_vm3 = vcmp.gt.f32.partialorder %v135_v46, 0.0  ;;  %v151_v50 = vmul.f32 0.2, %v135_v46 }
  0x92   :  { %v160_v52 = vsel %vm144_vm2, %v136_v45, %v152_v49  ;;  %v159_v55 = vsel %vm143_vm3, %v135_v46, %v151_v50 }
  0x93   :  { %v210_v56 = vpack.c.bf16 %v161_v53, %v160_v52  ;;  %v205_v57 = vpack.c.bf16 %v159_v55, %v158_v54 }
  0x95   :  { %225 = vst [vmem:[%s328_s3 + $0x8] sm:$0xff] %v210_v56   ;;  %v122_v60 = vpop.permute.xlu1 %121  ;;  %v117_v61 = vpop.permute.xlu0 %116 }
  0x96   :  { %206 = vst [vmem:[%s328_s3] sm:$0xff] %v205_v57   ;;  %v139_v63 = vadd.f32 %v122_v60, %v83_v59  ;;  %v138_v0 = vadd.f32 %v117_v61, %v82_v58 }
  0x98   :  { %vm147_vm4 = vcmp.gt.f32.partialorder %v139_v63, 0.0  ;;  %v155_v2 = vmul.f32 0.2, %v139_v63  ;;  %vm146_vm5 = vcmp.gt.f32.partialorder %v138_v0, 0.0  ;;  %v154_v3 = vmul.f32 0.2, %v138_v0 }
  0x9a   :  { %v163_v6 = vsel %vm147_vm4, %v139_v63, %v155_v2  ;;  %v162_v7 = vsel %vm146_vm5, %v138_v0, %v154_v3 }
  0x9b   :  { %v215_v8 = vpack.c.bf16 %v163_v6, %v162_v7 }
  0x9d   :  { %226 = vst [vmem:[%s328_s3 + $0x10] sm:$0xff] %v215_v8   ;;  %v132_v10 = vpop.permute.xlu0 %131 }
  0x9e   :  { %v141_v12 = vadd.f32 %v132_v10, %v85_v9 }
  0xa0   :  { %vm149_vm7 = vcmp.gt.f32.partialorder %v141_v12, 0.0  ;;  %v157_v13 = vmul.f32 0.2, %v141_v12 }
  0xa2   :  { %v165_v15 = vsel %vm149_vm7, %v141_v12, %v157_v13 }
  0xa3   :  { %v220_v16 = vpack.c.bf16 %v165_v15, %v164_v14 }
  0xa5   :  { %227 = vst [vmem:[%s328_s3 + $0x18] sm:$0xff] %v220_v16  }

// kernel: discriminator_forward.12
= control target key start
LH: loop header
LB: loop body
LE: loop exit
PB: predicated region body
PF: predicated region fallthrough
CT: control target
= control target key end

     0   :  { %s1106_s1 = inlined_call_operand.vmem [shape: bf16[512,128], index: 1, kind: input, shape index: {}]   ;;  %s1107_s0 = inlined_call_operand.vmem [shape: bf16[64,512], index: 0, kind: input, shape index: {}]   ;;  %s1108_s2 = inlined_call_operand.vmem [shape: bf16[64,128], index: 2, kind: output, shape index: {0}]   ;;  %s1109_s3 = inlined_call_operand.vmem [shape: f32[64,128], index: 3, kind: output, shape index: {1}]   ;;  %s1110_s4 = inlined_call_operand.vmem [shape: f32[64,128], index: 4, kind: output, shape index: {2}]  }
   0x1   :  { %v781_v0 = vld [vmem:[%s1106_s1 + $0x38] sm:$0xff]  ;;  %v780_v4 = vld [vmem:[%s1106_s1 + $0x30] sm:$0xff]  ;;  %v779_v8 = vld [vmem:[%s1106_s1 + $0x28] sm:$0xff] }
   0x2   :  { %v789_v1 = vld [vmem:[%s1106_s1 + $0x78] sm:$0xff]  ;;  %366 = vmatpush.bf16.msra.mxu0 %v781_v0  ;;  %v788_v5 = vld [vmem:[%s1106_s1 + $0x70] sm:$0xff]  ;;  %v787_v9 = vld [vmem:[%s1106_s1 + $0x68] sm:$0xff] }
   0x3   :  { %v797_v2 = vld [vmem:[%s1106_s1 + $0xb8] sm:$0xff]  ;;  %395 = vmatpush.bf16.msra.mxu1 %v789_v1  ;;  %v796_v6 = vld [vmem:[%s1106_s1 + $0xb0] sm:$0xff]  ;;  %v795_v10 = vld [vmem:[%s1106_s1 + $0xa8] sm:$0xff] }
   0x4   :  { %v805_v3 = vld [vmem:[%s1106_s1 + $0xf8] sm:$0xff]  ;;  %424 = vmatpush.bf16.msra.mxu2 %v797_v2  ;;  %v804_v7 = vld [vmem:[%s1106_s1 + $0xf0] sm:$0xff]  ;;  %v803_v11 = vld [vmem:[%s1106_s1 + $0xe8] sm:$0xff] }
   0x5   :  { %453 = vmatpush.bf16.msra.mxu3 %v805_v3  ;;  %v778_v12 = vld [vmem:[%s1106_s1 + $0x20] sm:$0xff]  ;;  %v777_v16 = vld [vmem:[%s1106_s1 + $0x18] sm:$0xff]  ;;  %v776_v20 = vld [vmem:[%s1106_s1 + $0x10] sm:$0xff] }
   0x6   :  { %367 = vmatpush.bf16.msra.mxu0 %v780_v4  ;;  %v786_v13 = vld [vmem:[%s1106_s1 + $0x60] sm:$0xff]  ;;  %v785_v17 = vld [vmem:[%s1106_s1 + $0x58] sm:$0xff]  ;;  %v784_v21 = vld [vmem:[%s1106_s1 + $0x50] sm:$0xff] }
   0x7   :  { %396 = vmatpush.bf16.msra.mxu1 %v788_v5  ;;  %v794_v14 = vld [vmem:[%s1106_s1 + $0xa0] sm:$0xff]  ;;  %v793_v18 = vld [vmem:[%s1106_s1 + $0x98] sm:$0xff]  ;;  %v792_v22 = vld [vmem:[%s1106_s1 + $0x90] sm:$0xff] }
   0x8   :  { %425 = vmatpush.bf16.msra.mxu2 %v796_v6  ;;  %v802_v15 = vld [vmem:[%s1106_s1 + $0xe0] sm:$0xff]  ;;  %v801_v19 = vld [vmem:[%s1106_s1 + $0xd8] sm:$0xff]  ;;  %v800_v23 = vld [vmem:[%s1106_s1 + $0xd0] sm:$0xff] }
   0x9   :  { %454 = vmatpush.bf16.msra.mxu3 %v804_v7  ;;  %v775_v24 = vld [vmem:[%s1106_s1 + $0x8] sm:$0xff]  ;;  %v774_v28 = vld [vmem:[%s1106_s1] sm:$0xff]  ;;  %v760_v33 = vld [vmem:[%s1107_s0 + $0xc] sm:$0xf0] }
   0xa   :  { %368 = vmatpush.bf16.msra.mxu0 %v779_v8  ;;  %v783_v25 = vld [vmem:[%s1106_s1 + $0x48] sm:$0xff]  ;;  %v782_v29 = vld [vmem:[%s1106_s1 + $0x40] sm:$0xff]  ;;  %v570_v35 = vld [vmem:[%s1107_s0 + $0x10] sm:$0xf0] }
   0xb   :  { %397 = vmatpush.bf16.msra.mxu1 %v787_v9  ;;  %v791_v26 = vld [vmem:[%s1106_s1 + $0x88] sm:$0xff]  ;;  %v790_v30 = vld [vmem:[%s1106_s1 + $0x80] sm:$0xff]  ;;  %v761_v37 = vld [vmem:[%s1107_s0 + $0x14] sm:$0xf0] }
   0xc   :  { %426 = vmatpush.bf16.msra.mxu2 %v795_v10  ;;  %v799_v27 = vld [vmem:[%s1106_s1 + $0xc8] sm:$0xff]  ;;  %v798_v31 = vld [vmem:[%s1106_s1 + $0xc0] sm:$0xff]  ;;  %v578_v39 = vld [vmem:[%s1107_s0 + $0x18] sm:$0xf0] }
   0xd   :  { %455 = vmatpush.bf16.msra.mxu3 %v803_v11  ;;  %v568_v32 = vld [vmem:[%s1107_s0] sm:$0xf]  ;;  %v758_v34 = vld [vmem:[%s1107_s0 + $0x4] sm:$0xf]  ;;  %v576_v36 = vld [vmem:[%s1107_s0 + $0x8] sm:$0xf] }
   0xe   :  { %369 = vmatpush.bf16.msra.mxu0 %v778_v12  ;;  %v759_v38 = vld [vmem:[%s1107_s0 + $0xc] sm:$0xf]  ;;  %v569_v40 = vor.u32 %v760_v33, %v568_v32  ;;  %v573_v41 = vor.u32 %v758_v34, %v570_v35  ;;  %v577_v42 = vor.u32 %v761_v37, %v576_v36  ;;  %v584_v44 = vld [vmem:[%s1107_s0 + $0x20] sm:$0xf]  ;;  %v764_v45 = vld [vmem:[%s1107_s0 + $0x2c] sm:$0xf0] }
   0xf   :  { %398 = vmatpush.bf16.msra.mxu1 %v786_v13  ;;  %v581_v43 = vor.u32 %v759_v38, %v578_v39  ;;  %v762_v46 = vld [vmem:[%s1107_s0 + $0x24] sm:$0xf]  ;;  %v586_v47 = vld [vmem:[%s1107_s0 + $0x30] sm:$0xf0]  ;;  %v592_v48 = vld [vmem:[%s1107_s0 + $0x28] sm:$0xf]  ;;  %v585_v52 = vor.u32 %v764_v45, %v584_v44 }
  0x10   :  { %427 = vmatpush.bf16.msra.mxu2 %v794_v14  ;;  %v765_v49 = vld [vmem:[%s1107_s0 + $0x34] sm:$0xf0]  ;;  %v763_v50 = vld [vmem:[%s1107_s0 + $0x2c] sm:$0xf]  ;;  %v594_v51 = vld [vmem:[%s1107_s0 + $0x38] sm:$0xf0]  ;;  %v589_v53 = vor.u32 %v762_v46, %v586_v47 }
  0x11   :  { %456 = vmatpush.bf16.msra.mxu3 %v802_v15  ;;  %v593_v54 = vor.u32 %v765_v49, %v592_v48  ;;  %v597_v55 = vor.u32 %v763_v50, %v594_v51  ;;  %v600_v56 = vld [vmem:[%s1107_s0 + $0x40] sm:$0xf]  ;;  %v768_v57 = vld [vmem:[%s1107_s0 + $0x4c] sm:$0xf0]  ;;  %v766_v58 = vld [vmem:[%s1107_s0 + $0x44] sm:$0xf] }
  0x12   :  { %370 = vmatpush.bf16.msra.mxu0 %v777_v16  ;;  %v602_v59 = vld [vmem:[%s1107_s0 + $0x50] sm:$0xf0]  ;;  %v608_v60 = vld [vmem:[%s1107_s0 + $0x48] sm:$0xf]  ;;  %v769_v61 = vld [vmem:[%s1107_s0 + $0x54] sm:$0xf0]  ;;  %v601_v0 = vor.u32 %v768_v57, %v600_v56 }
  0x13   :  { %399 = vmatpush.bf16.msra.mxu1 %v785_v17  ;;  %v767_v62 = vld [vmem:[%s1107_s0 + $0x4c] sm:$0xf]  ;;  %v610_v63 = vld [vmem:[%s1107_s0 + $0x58] sm:$0xf0]  ;;  %v605_v1 = vor.u32 %v766_v58, %v602_v59  ;;  %v609_v2 = vor.u32 %v769_v61, %v608_v60  ;;  %v616_v4 = vld [vmem:[%s1107_s0 + $0x60] sm:$0xf] }
  0x14   :  { %428 = vmatpush.bf16.msra.mxu2 %v793_v18  ;;  %v613_v3 = vor.u32 %v767_v62, %v610_v63  ;;  %v772_v5 = vld [vmem:[%s1107_s0 + $0x6c] sm:$0xf0]  ;;  %v770_v6 = vld [vmem:[%s1107_s0 + $0x64] sm:$0xf]  ;;  %v618_v7 = vld [vmem:[%s1107_s0 + $0x70] sm:$0xf0] }
  0x15   :  { %457 = vmatpush.bf16.msra.mxu3 %v801_v19  ;;  %v624_v8 = vld [vmem:[%s1107_s0 + $0x68] sm:$0xf]  ;;  %v773_v9 = vld [vmem:[%s1107_s0 + $0x74] sm:$0xf0]  ;;  %v771_v10 = vld [vmem:[%s1107_s0 + $0x6c] sm:$0xf]  ;;  %v617_v12 = vor.u32 %v772_v5, %v616_v4  ;;  %v621_v13 = vor.u32 %v770_v6, %v618_v7 }
  0x16   :  { %371 = vmatpush.bf16.msra.mxu0 %v776_v20  ;;  %v626_v11 = vld [vmem:[%s1107_s0 + $0x78] sm:$0xf0]  ;;  %v625_v14 = vor.u32 %v773_v9, %v624_v8 }
  0x17   :  { %400 = vmatpush.bf16.msra.mxu1 %v784_v21  ;;  %v629_v15 = vor.u32 %v771_v10, %v626_v11 }
  0x18   :  { %429 = vmatpush.bf16.msra.mxu2 %v792_v22 }
  0x19   :  { %458 = vmatpush.bf16.msra.mxu3 %v800_v23 }
  0x1a   :  { %372 = vmatpush.bf16.msra.mxu0 %v775_v24 }
  0x1b   :  { %401 = vmatpush.bf16.msra.mxu1 %v783_v25 }
  0x1c   :  { %430 = vmatpush.bf16.msra.mxu2 %v791_v26 }
  0x1d   :  { %459 = vmatpush.bf16.msra.mxu3 %v799_v27 }
  0x1e   :  { %373 = vmatpush.bf16.msra.mxu0 %v774_v28 }
  0x1f   :  { %402 = vmatpush.bf16.msra.mxu1 %v782_v29 }
  0x20   :  { %431 = vmatpush.bf16.msra.mxu2 %v790_v30 }
  0x21   :  { %460 = vmatpush.bf16.msra.mxu3 %v798_v31  ;;  %374 = vmatmul.bf16.vlgmr.msra.gmra.mxu0 %v569_v40 }
  0x22   :  { %403 = vmatmul.bf16.vlgmr.msra.gmra.mxu1 %v573_v41 }
  0x23   :  { %432 = vmatmul.bf16.vlgmr.msra.gmra.mxu2 %v577_v42 }
  0x24   :  { %461 = vmatmul.bf16.vlgmr.msra.gmra.mxu3 %v581_v43 }
  0x31   :  { %379 = vmatmul.bf16.gmra.mxu0 %v585_v52 }
  0x32   :  { %408 = vmatmul.bf16.gmra.mxu1 %v589_v53 }
  0x33   :  { %437 = vmatmul.bf16.gmra.mxu2 %v593_v54 }
  0x34   :  { %466 = vmatmul.bf16.gmra.mxu3 %v597_v55 }
  0x41   :  { %384 = vmatmul.bf16.gmra.mxu0 %v601_v0 }
  0x42   :  { %413 = vmatmul.bf16.gmra.mxu1 %v605_v1 }
  0x43   :  { %442 = vmatmul.bf16.gmra.mxu2 %v609_v2 }
  0x44   :  { %471 = vmatmul.bf16.gmra.mxu3 %v613_v3 }
  0x51   :  { %389 = vmatmul.bf16.gmra.mxu0 %v617_v12 }
  0x52   :  { %418 = vmatmul.bf16.gmra.mxu1 %v621_v13 }
  0x53   :  { %447 = vmatmul.bf16.gmra.mxu2 %v625_v14 }
  0x54   :  { %476 = vmatmul.bf16.gmra.mxu3 %v629_v15 }
  0x9e   :  { %v375_v16 = vpop.f32.mrf.mxu0 }
  0x9f   :  { %v404_v17 = vpop.f32.mrf.mxu1 }
  0xa0   :  { %v405_v18 = vadd.f32 %v404_v17, %v375_v16 }
  0xa6   :  { %v433_v19 = vpop.f32.mrf.mxu2  ;;  %v377_v22 = vpop.f32.mrf.mxu0 }
  0xa7   :  { %v462_v20 = vpop.f32.mrf.mxu3  ;;  %v434_v21 = vadd.f32 %v433_v19, %v405_v18  ;;  %v406_v23 = vpop.f32.mrf.mxu1 }
  0xa8   :  { %v407_v26 = vadd.f32 %v406_v23, %v377_v22 }
  0xa9   :  { %v463_v24 = vadd.f32 %v462_v20, %v434_v21 }
  0xab   :  { %498 = vadd.xlane.f32.xlu0 %v463_v24  ;;  %v514_v25 = vmul.f32 %v463_v24, %v463_v24 }
  0xad   :  { %522 = vadd.xlane.f32.xlu2 %v514_v25 }
  0xae   :  { %v435_v27 = vpop.f32.mrf.mxu2  ;;  %v380_v30 = vpop.f32.mrf.mxu0 }
  0xaf   :  { %v464_v28 = vpop.f32.mrf.mxu3  ;;  %v436_v29 = vadd.f32 %v435_v27, %v407_v26  ;;  %v409_v31 = vpop.f32.mrf.mxu1 }
  0xb0   :  { %v410_v34 = vadd.f32 %v409_v31, %v380_v30 }
  0xb1   :  { %v465_v32 = vadd.f32 %v464_v28, %v436_v29 }
  0xb3   :  { %v809_v33 = vpack.c.bf16 %v465_v32, %v463_v24  ;;  %500 = vadd.xlane.f32.xlu0 %v465_v32  ;;  %v515_v41 = vmul.f32 %v465_v32, %v465_v32 }
  0xb5   :  { %810 = vst [vmem:[%s1108_s2] sm:$0xff] %v809_v33  }
  0xb6   :  { %v438_v35 = vpop.f32.mrf.mxu2  ;;  %v382_v38 = vpop.f32.mrf.mxu0 }
  0xb7   :  { %v467_v36 = vpop.f32.mrf.mxu3  ;;  %v439_v37 = vadd.f32 %v438_v35, %v410_v34  ;;  %v411_v39 = vpop.f32.mrf.mxu1 }
  0xb8   :  { %v412_v42 = vadd.f32 %v411_v39, %v382_v38 }
  0xb9   :  { %v468_v40 = vadd.f32 %v467_v36, %v439_v37 }
  0xbb   :  { %502 = vadd.xlane.f32.xlu1 %v468_v40  ;;  %524 = vadd.xlane.f32.xlu0 %v515_v41  ;;  %v516_v49 = vmul.f32 %v468_v40, %v468_v40 }
  0xbe   :  { %v440_v43 = vpop.f32.mrf.mxu2  ;;  %v385_v46 = vpop.f32.mrf.mxu0 }
  0xbf   :  { %v469_v44 = vpop.f32.mrf.mxu3  ;;  %v441_v45 = vadd.f32 %v440_v43, %v412_v42  ;;  %v414_v47 = vpop.f32.mrf.mxu1 }
  0xc0   :  { %v415_v51 = vadd.f32 %v414_v47, %v385_v46 }
  0xc1   :  { %v470_v48 = vadd.f32 %v469_v44, %v441_v45 }
  0xc3   :  { %v814_v50 = vpack.c.bf16 %v470_v48, %v468_v40  ;;  %526 = vadd.xlane.f32.xlu1 %v516_v49  ;;  %v517_v52 = vmul.f32 %v470_v48, %v470_v48 }
  0xc5   :  { %826 = vst [vmem:[%s1108_s2 + $0x8] sm:$0xff] %v814_v50   ;;  %528 = vadd.xlane.f32.xlu2 %v517_v52 }
  0xc6   :  { %v443_v53 = vpop.f32.mrf.mxu2  ;;  %v387_v56 = vpop.f32.mrf.mxu0 }
  0xc7   :  { %v472_v54 = vpop.f32.mrf.mxu3  ;;  %v444_v55 = vadd.f32 %v443_v53, %v415_v51  ;;  %v416_v57 = vpop.f32.mrf.mxu1 }
  0xc8   :  { %v417_v60 = vadd.f32 %v416_v57, %v387_v56 }
  0xc9   :  { %v473_v58 = vadd.f32 %v472_v54, %v444_v55 }
  0xcb   :  { %504 = vadd.xlane.f32.xlu1 %v470_v48  ;;  %v518_v59 = vmul.f32 %v473_v58, %v473_v58 }
  0xcd   :  { %530 = vadd.xlane.f32.xlu0 %v518_v59  ;;  %506 = vadd.xlane.f32.xlu2 %v473_v58 }
  0xce   :  { %v445_v61 = vpop.f32.mrf.mxu2  ;;  %v390_v0 = vpop.f32.mrf.mxu0 }
  0xcf   :  { %v474_v62 = vpop.f32.mrf.mxu3  ;;  %v446_v63 = vadd.f32 %v445_v61, %v417_v60  ;;  %v419_v1 = vpop.f32.mrf.mxu1 }
  0xd0   :  { %v420_v4 = vadd.f32 %v419_v1, %v390_v0 }
  0xd1   :  { %v475_v2 = vadd.f32 %v474_v62, %v446_v63 }
  0xd3   :  { %v819_v3 = vpack.c.bf16 %v475_v2, %v473_v58  ;;  %v519_v19 = vmul.f32 %v475_v2, %v475_v2 }
  0xd5   :  { %827 = vst [vmem:[%s1108_s2 + $0x10] sm:$0xff] %v819_v3   ;;  %508 = vadd.xlane.f32.xlu2 %v475_v2 }
  0xd6   :  { %v448_v5 = vpop.f32.mrf.mxu2  ;;  %v392_v9 = vpop.f32.mrf.mxu0 }
  0xd7   :  { %v477_v6 = vpop.f32.mrf.mxu3  ;;  %v449_v7 = vadd.f32 %v448_v5, %v420_v4  ;;  %v421_v10 = vpop.f32.mrf.mxu1 }
  0xd8   :  { %v422_v12 = vadd.f32 %v421_v10, %v392_v9 }
  0xd9   :  { %v478_v8 = vadd.f32 %v477_v6, %v449_v7 }
  0xdb   :  { %510 = vadd.xlane.f32.xlu0 %v478_v8  ;;  %v520_v11 = vmul.f32 %v478_v8, %v478_v8 }
  0xdd   :  { %534 = vadd.xlane.f32.xlu2 %v520_v11 }
  0xde   :  { %v450_v13 = vpop.f32.mrf.mxu2 }
  0xdf   :  { %v451_v14 = vadd.f32 %v450_v13, %v422_v12  ;;  %v479_v15 = vpop.f32.mrf.mxu3 }
  0xe1   :  { %v480_v16 = vadd.f32 %v479_v15, %v451_v14 }
  0xe3   :  { %v824_v17 = vpack.c.bf16 %v480_v16, %v478_v8  ;;  %512 = vadd.xlane.f32.xlu1 %v480_v16  ;;  %v521_v18 = vmul.f32 %v480_v16, %v480_v16 }
  0xe5   :  { %828 = vst [vmem:[%s1108_s2 + $0x18] sm:$0xff] %v824_v17   ;;  %536 = vadd.xlane.f32.xlu0 %v521_v18 }
  0xeb   :  { %532 = vadd.xlane.f32.xlu1 %v519_v19 }
 0x11e   :  { %v499_v20 = vpop.xlane.xlu0 %498 }
 0x11f   :  { %538 = vst [vmem:[%s1109_s3] sm:$0xff] %v499_v20 }
 0x120   :  { %v523_v21 = vpop.xlane.xlu2 %522 }
 0x121   :  { %546 = vst [vmem:[%s1110_s4] sm:$0xff] %v523_v21 }
 0x126   :  { %v501_v22 = vpop.xlane.xlu0 %500 }
 0x127   :  { %539 = vst [vmem:[%s1109_s3 + $0x8] sm:$0xff] %v501_v22 }
 0x12e   :  { %v503_v23 = vpop.xlane.xlu1 %502  ;;  %v525_v24 = vpop.xlane.xlu0 %524 }
 0x12f   :  { %540 = vst [vmem:[%s1109_s3 + $0x10] sm:$0xff] %v503_v23 }
 0x130   :  { %547 = vst [vmem:[%s1110_s4 + $0x8] sm:$0xff] %v525_v24 }
 0x136   :  { %v527_v25 = vpop.xlane.xlu1 %526 }
 0x137   :  { %548 = vst [vmem:[%s1110_s4 + $0x10] sm:$0xff] %v527_v25 }
 0x138   :  { %v529_v26 = vpop.xlane.xlu2 %528 }
 0x139   :  { %549 = vst [vmem:[%s1110_s4 + $0x18] sm:$0xff] %v529_v26 }
 0x13e   :  { %v505_v27 = vpop.xlane.xlu1 %504 }
 0x13f   :  { %541 = vst [vmem:[%s1109_s3 + $0x18] sm:$0xff] %v505_v27 }
 0x140   :  { %v531_v28 = vpop.xlane.xlu0 %530  ;;  %v507_v29 = vpop.xlane.xlu2 %506 }
 0x141   :  { %550 = vst [vmem:[%s1110_s4 + $0x20] sm:$0xff] %v531_v28 }
 0x142   :  { %542 = vst [vmem:[%s1109_s3 + $0x20] sm:$0xff] %v507_v29 }
 0x148   :  { %v509_v30 = vpop.xlane.xlu2 %508 }
 0x149   :  { %543 = vst [vmem:[%s1109_s3 + $0x28] sm:$0xff] %v509_v30 }
 0x14e   :  { %v511_v31 = vpop.xlane.xlu0 %510 }
 0x14f   :  { %544 = vst [vmem:[%s1109_s3 + $0x30] sm:$0xff] %v511_v31 }
 0x150   :  { %v535_v32 = vpop.xlane.xlu2 %534 }
 0x151   :  { %552 = vst [vmem:[%s1110_s4 + $0x30] sm:$0xff] %v535_v32 }
 0x156   :  { %v513_v33 = vpop.xlane.xlu1 %512 }
 0x157   :  { %545 = vst [vmem:[%s1109_s3 + $0x38] sm:$0xff] %v513_v33 }
 0x158   :  { %v537_v34 = vpop.xlane.xlu0 %536 }
 0x159   :  { %553 = vst [vmem:[%s1110_s4 + $0x38] sm:$0xff] %v537_v34 }
 0x15e   :  { %v533_v35 = vpop.xlane.xlu1 %532 }
 0x15f   :  { %551 = vst [vmem:[%s1110_s4 + $0x28] sm:$0xff] %v533_v35 }

</bundles_post_ra>
